<compile_context>
chip_gen: v7x
topology: tpu7x:2x2x1
jax: 0.10.0
libtpu: 0.0.40
codegen_flags: <defaults>
</compile_context>

<pallas_src>
import functools

import jax
import jax.numpy as jnp
from jax import lax
from jax.experimental import pallas as pl
from jax.experimental.pallas import tpu as pltpu

NEG_SLOPE = 0.01   # nn.LeakyReLU default
LN_EPS = 1e-5      # nn.LayerNorm default


def _round_up(a, m):
    return ((a + m - 1) // m) * m


def _layer_norm(x):
    # LayerNorm with weight=1, bias=0 (module's _init_weights never touches LN params)
    mean = jnp.mean(x, axis=-1, keepdims=True)
    var = jnp.mean((x - mean) ** 2, axis=-1, keepdims=True)
    return (x - mean) * lax.rsqrt(var + LN_EPS)


def _leaky_relu(x):
    return jnp.where(x > 0, x, NEG_SLOPE * x)


def _const_spec(a):
    zeros = (0,) * a.ndim
    return pl.BlockSpec(a.shape, lambda s: zeros)


# --------------------------------------------------------------------------------------
# Kernel 1: encode() (streamed masked-mean pool over S) + reparameterize + ring_encoder
#           + ring_predictor + latent_to_rnn_hidden + time-invariant GRU gate bias.
#           All results packed into a single lane-dense output slab.
# --------------------------------------------------------------------------------------
def enc_cond_kernel(num_hidden, L, out_pad, *refs):
    x_ref, mask_ref, eps_ref, ring_ref = refs[0:4]
    idx = 4
    layer_refs = []
    for _ in range(num_hidden):
        layer_refs.append((refs[idx], refs[idx + 1]))
        idx += 2
    (w_mulv, b_mulv,
     wr1, br1, wr2, br2,
     wp1, bp1, wp2, bp2, wp3, bp3,
     w_l2h, b_h,
     wi_ring, bi_fused) = refs[idx:idx + 16]
    idx += 16
    out_ref, sum_ref, cnt_ref = refs[idx:idx + 3]

    s = pl.program_id(0)

    @pl.when(s == 0)
    def _init():
        sum_ref[...] = jnp.zeros_like(sum_ref)
        cnt_ref[...] = jnp.zeros_like(cnt_ref)

    # Streamed masked sum over the S grid axis (x never whole-array resident in VMEM).
    x = x_ref[...]                                   # [Bp, S_TILE, D]
    m = mask_ref[...]                                # [Bp, S_TILE]
    sum_ref[...] += jnp.sum(x * m[:, :, None], axis=1)
    cnt_ref[...] += jnp.sum(m, axis=1, keepdims=True)

    @pl.when(s == pl.num_programs(0) - 1)
    def _finalize():
        pooled = sum_ref[...] / (cnt_ref[...] + 1e-8)          # [Bp, D]

        # encoder MLP (bf16 MXU inputs, f32 accumulation)
        h = pooled
        for w_r, b_r in layer_refs:
            h = jnp.dot(h.astype(jnp.bfloat16), w_r[...],
                        preferred_element_type=jnp.float32) + b_r[...]
            h = _leaky_relu(_layer_norm(h))
            # TODO(synk): nn.Dropout(0.1) treated as eval-mode identity (no RNG dropout).

        # fused fc_mu / fc_logvar: one matmul with N = 2L
        mulv = jnp.dot(h, w_mulv[...], preferred_element_type=jnp.float32) + b_mulv[...]
        mu = mulv[:, :L]
        logvar = mulv[:, L:]

        # reparameterize (eps supplied from outside)
        z = mu + eps_ref[...] * jnp.exp(0.5 * logvar)

        # ring_encoder: Linear(1,R) as broadcasted multiply, then Linear(R,R)
        re = ring_ref[...] * wr1[...] + br1[...]
        re = _leaky_relu(_layer_norm(re))
        re = jnp.dot(re, wr2[...], preferred_element_type=jnp.float32) + br2[...]
        re = _leaky_relu(_layer_norm(re))

        # ring_predictor(mu)  (matches reference: predicted from mu, not z)
        p = jnp.dot(mu, wp1[...], preferred_element_type=jnp.float32) + bp1[...]
        p = _leaky_relu(_layer_norm(p))
        p = jnp.dot(p, wp2[...], preferred_element_type=jnp.float32) + bp2[...]
        p = _leaky_relu(_layer_norm(p))
        pred = jnp.dot(p, wp3[...], preferred_element_type=jnp.float32) + bp3[...]

        # h0 = latent_to_rnn_hidden(cat([z, ring_emb])) as ONE matmul
        zr = jnp.concatenate([z, re], axis=-1)
        h0 = jnp.dot(zr, w_l2h[...], preferred_element_type=jnp.float32) + b_h[...]

        # time-invariant GRU gate bias: ring_emb @ Wi_ring + (b_ih + b_hh[r,z]) (prefused)
        rbias = (jnp.dot(re, wi_ring[...], preferred_element_type=jnp.float32)
                 + bi_fused[...])

        pieces = [mu, logvar, pred, h0, rbias]
        if out_pad > 0:
            pieces.append(jnp.zeros((mu.shape[0], out_pad), jnp.float32))
        out_ref[...] = jnp.concatenate(pieces, axis=-1)        # single lane-dense store


def encode_cond_pallas(x, mask, eps, ring, p):
    Bp, S_pad, D = x.shape
    L = p["w_mulv"].shape[-1] // 2
    C = p["wp3"].shape[-1]
    H = p["b_h"].shape[-1]
    G3 = p["bi_fused"].shape[-1]                               # 3H
    tot = 2 * L + C + H + G3
    tot_p = _round_up(tot, 128)

    S_TILE = S_pad if S_pad <= 512 else 512
    assert S_pad % S_TILE == 0
    num_s = S_pad // S_TILE

    flat = [x, mask, eps, ring]
    for w, b in p["enc_layers"]:
        flat += [w, b]
    flat += [p["w_mulv"], p["b_mulv"],
             p["wr1"], p["br1"], p["wr2"], p["br2"],
             p["wp1"], p["bp1"], p["wp2"], p["bp2"], p["wp3"], p["bp3"],
             p["w_l2h"], p["b_h"],
             p["wi_ring"], p["bi_fused"]]

    in_specs = ([pl.BlockSpec((Bp, S_TILE, D), lambda s: (0, s, 0)),
                 pl.BlockSpec((Bp, S_TILE), lambda s: (0, s))]
                + [_const_spec(a) for a in flat[2:]])

    kernel = functools.partial(enc_cond_kernel, len(p["enc_layers"]), L, tot_p - tot)
    packed = pl.pallas_call(
        kernel,
        grid=(num_s,),
        in_specs=in_specs,
        out_specs=pl.BlockSpec((Bp, tot_p), lambda s: (0, 0)),
        out_shape=jax.ShapeDtypeStruct((Bp, tot_p), jnp.float32),
        scratch_shapes=[pltpu.VMEM((Bp, D), jnp.float32),      # masked sum accumulator
                        pltpu.VMEM((Bp, 1), jnp.float32)],     # mask count accumulator
        compiler_params=pltpu.CompilerParams(dimension_semantics=("arbitrary",)),
        # TODO(synk): set vmem_limit_bytes per generation (v7x physical VMEM is 64 MiB)
        # once run at production ESM sizes.
    )(*flat)
    offs = dict(mu=(0, L), logvar=(L, 2 * L), pred=(2 * L, 2 * L + C),
                h0=(2 * L + C, 2 * L + C + H), rbias=(2 * L + C + H, tot))
    return packed, offs


# --------------------------------------------------------------------------------------
# Kernel 2: GRU decoder (teacher forcing) + fc_out, chunked over T with the hidden state
#           carried in VMEM scratch across grid iterations.
# --------------------------------------------------------------------------------------
def gru_chunk_kernel(T_TILE, Bp, H,
                     x_ref, h0_ref, rbias_ref, wi_ref, wh_ref, bhn_ref, wo_ref, bo_ref,
                     out_ref, h_carry, gx_ref, hbuf_ref):
    @pl.when(pl.program_id(0) == 0)
    def _():
        h_carry[...] = h0_ref[...]

    # Bulk input projection for this T-chunk (bf16 MXU, f32 accumulation) with the
    # time-invariant gate bias (ring conditioning + b_ih + b_hh[r,z]) folded in once.
    gx_ref[...] = (jnp.dot(x_ref[...], wi_ref[...], preferred_element_type=jnp.float32)
                   + jnp.tile(rbias_ref[...], (T_TILE, 1)))

    wh = wh_ref[...]       # [H, 3H] fused Whr|Whz|Whn (kept f32 in the latency chain)
    bhn = bhn_ref[...]     # [1, H]  n-gate hidden bias (must stay gated by r)

    def step(t, h):
        row = pl.multiple_of(t * Bp, Bp)
        g = gx_ref[pl.ds(row, Bp), :]                                    # [Bp, 3H]
        hh = jnp.dot(h, wh, preferred_element_type=jnp.float32)          # [Bp, 3H]
        r = jax.nn.sigmoid(g[:, :H] + hh[:, :H])
        zg = jax.nn.sigmoid(g[:, H:2 * H] + hh[:, H:2 * H])
        n = jnp.tanh(g[:, 2 * H:] + r * (hh[:, 2 * H:] + bhn))
        h_new = (1.0 - zg) * n + zg * h
        hbuf_ref[pl.ds(row, Bp), :] = h_new
        return h_new

    h_final = lax.fori_loop(0, T_TILE, step, h_carry[...], unroll=True)
    h_carry[...] = h_final                      # carry hidden state to the next T-chunk

    # fc_out hoisted out of the recurrence: one lane-dense (Vp % 128 == 0) matmul per chunk
    out_ref[...] = (jnp.dot(hbuf_ref[...].astype(jnp.bfloat16), wo_ref[...],
                            preferred_element_type=jnp.float32) + bo_ref[...])


def gru_decode_pallas(dec_emb_tm, h0, rbias, gp, T_pad, T_TILE, Bp):
    H = h0.shape[-1]
    Vp = gp["wout_p"].shape[-1]
    num_t = T_pad // T_TILE
    kernel = functools.partial(gru_chunk_kernel, T_TILE, Bp, H)

    const_args = (h0, rbias, gp["wi_emb"], gp["wh"], gp["bhn"], gp["wout_p"], gp["bout_p"])
    return pl.pallas_call(
        kernel,
        grid=(num_t,),
        in_specs=([pl.BlockSpec((T_TILE * Bp, H), lambda t: (t, 0))]
                  + [_const_spec(a) for a in const_args]),
        out_specs=pl.BlockSpec((T_TILE * Bp, Vp), lambda t: (t, 0)),
        out_shape=jax.ShapeDtypeStruct((T_pad * Bp, Vp), jnp.float32),
        scratch_shapes=[pltpu.VMEM((Bp, H), jnp.float32),              # hidden-state carry
                        pltpu.VMEM((T_TILE * Bp, 3 * H), jnp.float32),  # per-chunk gx
                        pltpu.VMEM((T_TILE * Bp, H), jnp.float32)],     # per-chunk hidden states
        compiler_params=pltpu.CompilerParams(dimension_semantics=("arbitrary",)),
    )(dec_emb_tm, *const_args)


# --------------------------------------------------------------------------------------
# Parameter construction (deterministic, mimics the module's init scheme)
# --------------------------------------------------------------------------------------
def xavier_uniform(key, fan_in, fan_out):
    bound = (6.0 / (fan_in + fan_out)) ** 0.5
    return jax.random.uniform(key, (fan_in, fan_out), jnp.float32, -bound, bound)


def gru_uniform(key, shape, hidden):
    bound = 1.0 / (hidden ** 0.5)
    return jax.random.uniform(key, shape, jnp.float32, -bound, bound)


def build_params(key, input_dim, hidden_dims, latent_dim, vocab_size,
                 rnn_hidden_dim, ring_embedding_dim, num_classes):
    keys = iter(jax.random.split(key, 64))
    zeros = lambda n: jnp.zeros((1, n), jnp.float32)

    # encoder MLP (weights stored bf16 for MXU-native matmuls; biases f32)
    enc_layers = []
    d_in = input_dim
    for d_out in hidden_dims:
        enc_layers.append((xavier_uniform(next(keys), d_in, d_out).astype(jnp.bfloat16),
                           zeros(d_out)))
        d_in = d_out

    # fused fc_mu / fc_logvar
    L = latent_dim
    w_mulv = jnp.concatenate([xavier_uniform(next(keys), hidden_dims[-1], L),
                              xavier_uniform(next(keys), hidden_dims[-1], L)], axis=1)

    R, H, C = ring_embedding_dim, rnn_hidden_dim, num_classes
    w_l2h = xavier_uniform(next(keys), L + R, H)               # single [L+R, H] matmul

    # decoder embedding (nn.Embedding default init ~ N(0,1)); bf16 for the input projection
    embedding = jax.random.normal(next(keys), (vocab_size, H), jnp.float32).astype(jnp.bfloat16)

    # GRU weights (PyTorch default uniform(-1/sqrt(H), 1/sqrt(H))); fused gate order r,z,n
    In = H + R
    wi_full = gru_uniform(next(keys), (In, 3 * H), H)          # [Wir|Wiz|Win]
    wh_full = gru_uniform(next(keys), (H, 3 * H), H)           # [Whr|Whz|Whn]
    bi_full = gru_uniform(next(keys), (1, 3 * H), H)           # b_ih fused
    bh_full = gru_uniform(next(keys), (1, 3 * H), H)           # b_hh fused

    # fold b_ih + b_hh[r,z] into one time-invariant bias (the n-gate hidden bias is gated
    # by r and must stay inside the recurrence)
    bi_fused = bi_full + jnp.concatenate(
        [bh_full[:, :2 * H], jnp.zeros((1, H), jnp.float32)], axis=1)

    # fc_out, zero-padded in the vocab dim to a multiple of 128 lanes, bf16 weights
    V = vocab_size
    Vp = _round_up(V, 128)
    wout = xavier_uniform(next(keys), H, V)
    wout_p = jnp.concatenate([wout, jnp.zeros((H, Vp - V), jnp.float32)],
                             axis=1).astype(jnp.bfloat16)
    bout_p = jnp.zeros((1, Vp), jnp.float32)

    return dict(
        enc_layers=enc_layers,
        w_mulv=w_mulv, b_mulv=zeros(2 * L),
        wr1=xavier_uniform(next(keys), 1, R), br1=zeros(R),
        wr2=xavier_uniform(next(keys), R, R), br2=zeros(R),
        wp1=xavier_uniform(next(keys), L, 64), bp1=zeros(64),
        wp2=xavier_uniform(next(keys), 64, 32), bp2=zeros(32),
        wp3=xavier_uniform(next(keys), 32, C), bp3=zeros(C),
        w_l2h=w_l2h, b_h=zeros(H),
        wi_ring=wi_full[H:], bi_fused=bi_fused,                # consumed by kernel 1
        embedding=embedding,
        gru=dict(wi_emb=wi_full[:H].astype(jnp.bfloat16), wh=wh_full,
                 bhn=bh_full[:, 2 * H:], wout_p=wout_p, bout_p=bout_p),
        vocab_size=V,
    )


# --------------------------------------------------------------------------------------
# Full forward pass (teacher-forcing branch: target_ids and ring_info provided)
# --------------------------------------------------------------------------------------
def esm_vae_token_forward(params, x, attention_mask, target_ids, ring_info, eps_key,
                          sos_token_id=0):
    B, T = target_ids.shape
    S = x.shape[1]
    L = params["w_mulv"].shape[-1] // 2
    V = params["vocab_size"]

    # pad batch to a multiple of 8 (f32 sublane count) and S to the S-tile size
    Bp = _round_up(B, 8)
    S_TILE = _round_up(S, 8) if S <= 512 else 512
    S_pad = _round_up(S, S_TILE)

    eps = jax.random.normal(eps_key, (B, L), jnp.float32)

    def pad_to(a, n, axis):
        widths = [(0, 0)] * a.ndim
        widths[axis] = (0, n - a.shape[axis])
        return jnp.pad(a, widths)

    x_p = pad_to(pad_to(x, Bp, 0), S_pad, 1)
    mask_p = pad_to(pad_to(attention_mask.astype(jnp.float32), Bp, 0), S_pad, 1)
    eps_p = pad_to(eps, Bp, 0)
    ring_p = pad_to(ring_info.astype(jnp.float32)[:, None], Bp, 0)

    # 1) fused encode + reparameterize + ring conditioning + h0 + GRU gate bias,
    #    packed into one lane-dense output slab
    packed, offs = encode_cond_pallas(x_p, mask_p, eps_p, ring_p, params)
    mu = packed[:B, offs["mu"][0]:offs["mu"][1]]
    logvar = packed[:B, offs["logvar"][0]:offs["logvar"][1]]
    ring_pred = packed[:B, offs["pred"][0]:offs["pred"][1]]
    h0 = packed[:, offs["h0"][0]:offs["h0"][1]]               # keep Bp rows for kernel 2
    rbias = packed[:, offs["rbias"][0]:offs["rbias"][1]]

    # 2) teacher-forcing decoder inputs (time-major, padded to (T_pad, Bp))
    T_TILE = min(T, 8)      # TODO(synk): tune chunk size (32-64) at production T
    T_pad = _round_up(T, T_TILE)
    sos = jnp.full((B, 1), sos_token_id, dtype=target_ids.dtype)
    dec_ids = jnp.concatenate([sos, target_ids[:, :-1]], axis=1)     # [B, T]
    dec_ids_p = jnp.full((Bp, T_pad), sos_token_id, dtype=target_ids.dtype)
    dec_ids_p = dec_ids_p.at[:B, :T].set(dec_ids)
    ids_tm = jnp.transpose(dec_ids_p).reshape(-1)                    # [T_pad*Bp] time-major
    dec_emb_tm = jnp.take(params["embedding"], ids_tm, axis=0)       # [T_pad*Bp, H] bf16
    # TODO(synk): move this gather into kernel 2 (scalar-prefetch ids + manual DMA gather)
    # to save one HBM round trip of [T*B, H] at production H.

    # 3) chunked GRU decode + fc_out (vocab padded to 128 lanes inside, sliced back here)
    logits_flat = gru_decode_pallas(dec_emb_tm, h0, rbias, params["gru"], T_pad, T_TILE, Bp)
    Vp = logits_flat.shape[-1]
    logits = jnp.transpose(logits_flat.reshape(T_pad, Bp, Vp)[:T, :B, :V], (1, 0, 2))

    return logits, target_ids, mu, logvar, ring_pred


if __name__ == "__main__":
    # Small, shape-consistent configuration
    B, S = 2, 8                 # batch, ESM sequence length
    input_dim = 32
    hidden_dims = [64, 32]
    latent_dim = 16
    vocab_size = 24
    max_sequence_length = 10
    pad_token_id = 1
    rnn_hidden_dim = 32
    ring_embedding_dim = 16
    num_classes = 6

    root = jax.random.PRNGKey(0)
    k_param, k_x, k_tgt, k_eps = jax.random.split(root, 4)

    params = build_params(k_param, input_dim, hidden_dims, latent_dim, vocab_size,
                          rnn_hidden_dim, ring_embedding_dim, num_classes)

    x = jax.random.normal(k_x, (B, S, input_dim), jnp.float32)
    lens = jnp.array([8, 5], jnp.int32)
    attention_mask = (jnp.arange(S)[None, :] < lens[:, None]).astype(jnp.int32)
    target_ids = jax.random.randint(k_tgt, (B, max_sequence_length), 0, vocab_size, jnp.int32)
    ring_info = jnp.array([3, 5], jnp.int32)

    logits, tgt, mu, logvar, ring_pred = esm_vae_token_forward(
        params, x, attention_mask, target_ids, ring_info, k_eps)

    jax.block_until_ready((logits, mu, logvar, ring_pred))

    assert logits.shape == (B, max_sequence_length, vocab_size)
    assert mu.shape == (B, latent_dim) and logvar.shape == (B, latent_dim)
    assert ring_pred.shape == (B, num_classes)
    assert bool(jnp.all(jnp.isfinite(logits)))
    assert bool(jnp.all(jnp.isfinite(mu))) and bool(jnp.all(jnp.isfinite(ring_pred)))

    print("KERNEL_OK")
</pallas_src>

<mosaic_0001>
module attributes {stable_mosaic.version = 11 : i64} {
  func.func @enc_cond_kernel(%arg0: i32, %arg1: memref<8x8x32xf32, #tpu.memory_space<vmem>>, %arg2: memref<8x8xf32, #tpu.memory_space<vmem>>, %arg3: memref<8x16xf32, #tpu.memory_space<vmem>>, %arg4: memref<8x1xf32, #tpu.memory_space<vmem>>, %arg5: memref<32x64xbf16, #tpu.memory_space<vmem>>, %arg6: memref<1x64xf32, #tpu.memory_space<vmem>>, %arg7: memref<64x32xbf16, #tpu.memory_space<vmem>>, %arg8: memref<1x32xf32, #tpu.memory_space<vmem>>, %arg9: memref<32x32xf32, #tpu.memory_space<vmem>>, %arg10: memref<1x32xf32, #tpu.memory_space<vmem>>, %arg11: memref<1x16xf32, #tpu.memory_space<vmem>>, %arg12: memref<1x16xf32, #tpu.memory_space<vmem>>, %arg13: memref<16x16xf32, #tpu.memory_space<vmem>>, %arg14: memref<1x16xf32, #tpu.memory_space<vmem>>, %arg15: memref<16x64xf32, #tpu.memory_space<vmem>>, %arg16: memref<1x64xf32, #tpu.memory_space<vmem>>, %arg17: memref<64x32xf32, #tpu.memory_space<vmem>>, %arg18: memref<1x32xf32, #tpu.memory_space<vmem>>, %arg19: memref<32x6xf32, #tpu.memory_space<vmem>>, %arg20: memref<1x6xf32, #tpu.memory_space<vmem>>, %arg21: memref<32x32xf32, #tpu.memory_space<vmem>>, %arg22: memref<1x32xf32, #tpu.memory_space<vmem>>, %arg23: memref<16x96xf32, #tpu.memory_space<vmem>>, %arg24: memref<1x96xf32, #tpu.memory_space<vmem>>, %arg25: memref<8x256xf32, #tpu.memory_space<vmem>>, %arg26: memref<8x32xf32, #tpu.memory_space<vmem>>, %arg27: memref<8x1xf32, #tpu.memory_space<vmem>>) attributes {dimension_semantics = [#tpu.dimension_semantics<arbitrary>], iteration_bounds = array<i64: 1>, scalar_prefetch = 0 : i64, scratch_operands = 2 : i64, tpu.core_type = #tpu.core_type<tc>, window_params = [{transform_indices = @transform_0, window_bounds = array<i64: 8, 8, 32>}, {transform_indices = @transform_1, window_bounds = array<i64: 8, 8>}, {pipeline_mode = #tpu.pipeline_mode<synchronous>, transform_indices = @transform_2, window_bounds = array<i64: 8, 16>}, {pipeline_mode = #tpu.pipeline_mode<synchronous>, transform_indices = @transform_3, window_bounds = array<i64: 8, 1>}, {pipeline_mode = #tpu.pipeline_mode<synchronous>, transform_indices = @transform_4, window_bounds = array<i64: 32, 64>}, {pipeline_mode = #tpu.pipeline_mode<synchronous>, transform_indices = @transform_5, window_bounds = array<i64: 1, 64>}, {pipeline_mode = #tpu.pipeline_mode<synchronous>, transform_indices = @transform_6, window_bounds = array<i64: 64, 32>}, {pipeline_mode = #tpu.pipeline_mode<synchronous>, transform_indices = @transform_7, window_bounds = array<i64: 1, 32>}, {pipeline_mode = #tpu.pipeline_mode<synchronous>, transform_indices = @transform_8, window_bounds = array<i64: 32, 32>}, {pipeline_mode = #tpu.pipeline_mode<synchronous>, transform_indices = @transform_9, window_bounds = array<i64: 1, 32>}, {pipeline_mode = #tpu.pipeline_mode<synchronous>, transform_indices = @transform_10, window_bounds = array<i64: 1, 16>}, {pipeline_mode = #tpu.pipeline_mode<synchronous>, transform_indices = @transform_11, window_bounds = array<i64: 1, 16>}, {pipeline_mode = #tpu.pipeline_mode<synchronous>, transform_indices = @transform_12, window_bounds = array<i64: 16, 16>}, {pipeline_mode = #tpu.pipeline_mode<synchronous>, transform_indices = @transform_13, window_bounds = array<i64: 1, 16>}, {pipeline_mode = #tpu.pipeline_mode<synchronous>, transform_indices = @transform_14, window_bounds = array<i64: 16, 64>}, {pipeline_mode = #tpu.pipeline_mode<synchronous>, transform_indices = @transform_15, window_bounds = array<i64: 1, 64>}, {pipeline_mode = #tpu.pipeline_mode<synchronous>, transform_indices = @transform_16, window_bounds = array<i64: 64, 32>}, {pipeline_mode = #tpu.pipeline_mode<synchronous>, transform_indices = @transform_17, window_bounds = array<i64: 1, 32>}, {pipeline_mode = #tpu.pipeline_mode<synchronous>, transform_indices = @transform_18, window_bounds = array<i64: 32, 6>}, {pipeline_mode = #tpu.pipeline_mode<synchronous>, transform_indices = @transform_19, window_bounds = array<i64: 1, 6>}, {pipeline_mode = #tpu.pipeline_mode<synchronous>, transform_indices = @transform_20, window_bounds = array<i64: 32, 32>}, {pipeline_mode = #tpu.pipeline_mode<synchronous>, transform_indices = @transform_21, window_bounds = array<i64: 1, 32>}, {pipeline_mode = #tpu.pipeline_mode<synchronous>, transform_indices = @transform_22, window_bounds = array<i64: 16, 96>}, {pipeline_mode = #tpu.pipeline_mode<synchronous>, transform_indices = @transform_23, window_bounds = array<i64: 1, 96>}, {pipeline_mode = #tpu.pipeline_mode<synchronous>, transform_indices = @transform_24, window_bounds = array<i64: 8, 256>}]} {
    %c0_i32 = arith.constant 0 : i32
    %0 = arith.cmpi eq, %arg0, %c0_i32 : i32
    %1 = arith.extui %0 : i1 to i32
    %c0_i32_0 = arith.constant 0 : i32
    %2 = arith.cmpi ne, %1, %c0_i32_0 : i32
    scf.if %2 {
      %cst_16 = arith.constant 0.000000e+00 : f32
      %20 = vector.broadcast %cst_16 : f32 to vector<8x32xf32>
      %c0_17 = arith.constant 0 : index
      %c0_18 = arith.constant 0 : index
      %21 = vector.load %arg26[%c0_17, %c0_18] : memref<8x32xf32, #tpu.memory_space<vmem>>, vector<8x32xf32>
      tpu.vector_store %arg26[%c0_17, %c0_18], %20 {strides = array<i32>} : memref<8x32xf32, #tpu.memory_space<vmem>>, vector<8x32xf32>,
      %cst_19 = arith.constant 0.000000e+00 : f32
      %22 = vector.broadcast %cst_19 : f32 to vector<8x1xf32>
      %c0_20 = arith.constant 0 : index
      %c0_21 = arith.constant 0 : index
      %23 = vector.load %arg27[%c0_20, %c0_21] : memref<8x1xf32, #tpu.memory_space<vmem>>, vector<8x1xf32>
      tpu.vector_store %arg27[%c0_20, %c0_21], %22 {strides = array<i32>} : memref<8x1xf32, #tpu.memory_space<vmem>>, vector<8x1xf32>,
    } else {
    }
    %c0 = arith.constant 0 : index
    %c0_1 = arith.constant 0 : index
    %c0_2 = arith.constant 0 : index
    %3 = vector.load %arg1[%c0, %c0_1, %c0_2] : memref<8x8x32xf32, #tpu.memory_space<vmem>>, vector<8x8x32xf32>
    %c0_3 = arith.constant 0 : index
    %c0_4 = arith.constant 0 : index
    %4 = vector.load %arg2[%c0_3, %c0_4] : memref<8x8xf32, #tpu.memory_space<vmem>>, vector<8x8xf32>
    %c0_5 = arith.constant 0 : index
    %c0_6 = arith.constant 0 : index
    %5 = vector.load %arg26[%c0_5, %c0_6] : memref<8x32xf32, #tpu.memory_space<vmem>>, vector<8x32xf32>
    %6 = vector.shape_cast %4 : vector<8x8xf32> to vector<8x8x1xf32>
    %7 = vector.broadcast %6 : vector<8x8x1xf32> to vector<8x8x32xf32>
    %8 = arith.mulf %3, %7 : vector<8x8x32xf32>
    %cst = arith.constant dense<0.000000e+00> : vector<8x32xf32>
    %9 = vector.multi_reduction <add>, %8, %cst [1] : vector<8x8x32xf32> to vector<8x32xf32>
    %10 = arith.addf %5, %9 : vector<8x32xf32>
    %c0_7 = arith.constant 0 : index
    %c0_8 = arith.constant 0 : index
    %11 = vector.load %arg26[%c0_7, %c0_8] : memref<8x32xf32, #tpu.memory_space<vmem>>, vector<8x32xf32>
    tpu.vector_store %arg26[%c0_7, %c0_8], %10 {strides = array<i32>} : memref<8x32xf32, #tpu.memory_space<vmem>>, vector<8x32xf32>,
    %c0_9 = arith.constant 0 : index
    %c0_10 = arith.constant 0 : index
    %12 = vector.load %arg27[%c0_9, %c0_10] : memref<8x1xf32, #tpu.memory_space<vmem>>, vector<8x1xf32>
    %cst_11 = arith.constant dense<0.000000e+00> : vector<8xf32>
    %13 = vector.multi_reduction <add>, %4, %cst_11 [1] : vector<8x8xf32> to vector<8xf32>
    %14 = vector.shape_cast %13 : vector<8xf32> to vector<8x1xf32>
    %15 = arith.addf %12, %14 : vector<8x1xf32>
    %c0_12 = arith.constant 0 : index
    %c0_13 = arith.constant 0 : index
    %16 = vector.load %arg27[%c0_12, %c0_13] : memref<8x1xf32, #tpu.memory_space<vmem>>, vector<8x1xf32>
    tpu.vector_store %arg27[%c0_12, %c0_13], %15 {strides = array<i32>} : memref<8x1xf32, #tpu.memory_space<vmem>>, vector<8x1xf32>,
    %c0_i32_14 = arith.constant 0 : i32
    %17 = arith.cmpi eq, %arg0, %c0_i32_14 : i32
    %18 = arith.extui %17 : i1 to i32
    %c0_i32_15 = arith.constant 0 : i32
    %19 = arith.cmpi ne, %18, %c0_i32_15 : i32
    scf.if %19 {
      %c0_16 = arith.constant 0 : index
      %c0_17 = arith.constant 0 : index
      %20 = vector.load %arg26[%c0_16, %c0_17] : memref<8x32xf32, #tpu.memory_space<vmem>>, vector<8x32xf32>
      %c0_18 = arith.constant 0 : index
      %c0_19 = arith.constant 0 : index
      %21 = vector.load %arg27[%c0_18, %c0_19] : memref<8x1xf32, #tpu.memory_space<vmem>>, vector<8x1xf32>
      %cst_20 = arith.constant 9.99999993E-9 : f32
      %22 = vector.broadcast %cst_20 : f32 to vector<8x1xf32>
      %23 = arith.addf %21, %22 : vector<8x1xf32>
      %24 = vector.broadcast %23 : vector<8x1xf32> to vector<8x32xf32>
      %25 = arith.divf %20, %24 : vector<8x32xf32>
      %26 = arith.truncf %25 : vector<8x32xf32> to vector<8x32xbf16>
      %c0_21 = arith.constant 0 : index
      %c0_22 = arith.constant 0 : index
      %27 = vector.load %arg5[%c0_21, %c0_22] : memref<32x64xbf16, #tpu.memory_space<vmem>>, vector<32x64xbf16>
      %cst_23 = arith.constant dense<0.000000e+00> : vector<8x64xf32>
      %28 = tpu.matmul %26, %27, %cst_23 {dimension_numbers = #tpu.dot_dimension_numbers<[1], [0], [0], [1], [0, 0, 1, 1], [], []>} : vector<8x32xbf16>, vector<32x64xbf16>, vector<8x64xf32> -> vector<8x64xf32>
      %c0_24 = arith.constant 0 : index
      %c0_25 = arith.constant 0 : index
      %29 = vector.load %arg6[%c0_24, %c0_25] : memref<1x64xf32, #tpu.memory_space<vmem>>, vector<1x64xf32>
      %30 = vector.broadcast %29 : vector<1x64xf32> to vector<8x64xf32>
      %31 = arith.addf %28, %30 : vector<8x64xf32>
      %cst_26 = arith.constant dense<0.000000e+00> : vector<8xf32>
      %32 = vector.multi_reduction <add>, %31, %cst_26 [1] : vector<8x64xf32> to vector<8xf32>
      %33 = vector.shape_cast %32 : vector<8xf32> to vector<8x1xf32>
      %cst_27 = arith.constant 6.400000e+01 : f32
      %34 = vector.broadcast %cst_27 : f32 to vector<8x1xf32>
      %35 = arith.divf %33, %34 : vector<8x1xf32>
      %36 = vector.broadcast %35 : vector<8x1xf32> to vector<8x64xf32>
      %37 = arith.subf %31, %36 : vector<8x64xf32>
      %38 = arith.mulf %37, %37 : vector<8x64xf32>
      %cst_28 = arith.constant dense<0.000000e+00> : vector<8xf32>
      %39 = vector.multi_reduction <add>, %38, %cst_28 [1] : vector<8x64xf32> to vector<8xf32>
      %40 = vector.shape_cast %39 : vector<8xf32> to vector<8x1xf32>
      %cst_29 = arith.constant 6.400000e+01 : f32
      %41 = vector.broadcast %cst_29 : f32 to vector<8x1xf32>
      %42 = arith.divf %40, %41 : vector<8x1xf32>
      %43 = vector.broadcast %35 : vector<8x1xf32> to vector<8x64xf32>
      %44 = arith.subf %31, %43 : vector<8x64xf32>
      %cst_30 = arith.constant 9.99999974E-6 : f32
      %45 = vector.broadcast %cst_30 : f32 to vector<8x1xf32>
      %46 = arith.addf %42, %45 : vector<8x1xf32>
      %47 = math.rsqrt %46 : vector<8x1xf32>
      %48 = vector.broadcast %47 : vector<8x1xf32> to vector<8x64xf32>
      %49 = arith.mulf %44, %48 : vector<8x64xf32>
      %cst_31 = arith.constant 0.000000e+00 : f32
      %50 = vector.broadcast %cst_31 : f32 to vector<8x64xf32>
      %51 = arith.cmpf ogt, %49, %50 : vector<8x64xf32>
      %cst_32 = arith.constant 0.00999999977 : f32
      %52 = vector.broadcast %cst_32 : f32 to vector<8x64xf32>
      %53 = arith.mulf %52, %49 : vector<8x64xf32>
      %54 = arith.select %51, %49, %53 : vector<8x64xi1>, vector<8x64xf32>
      %55 = arith.truncf %54 : vector<8x64xf32> to vector<8x64xbf16>
      %c0_33 = arith.constant 0 : index
      %c0_34 = arith.constant 0 : index
      %56 = vector.load %arg7[%c0_33, %c0_34] : memref<64x32xbf16, #tpu.memory_space<vmem>>, vector<64x32xbf16>
      %cst_35 = arith.constant dense<0.000000e+00> : vector<8x32xf32>
      %57 = tpu.matmul %55, %56, %cst_35 {dimension_numbers = #tpu.dot_dimension_numbers<[1], [0], [0], [1], [0, 0, 1, 1], [], []>} : vector<8x64xbf16>, vector<64x32xbf16>, vector<8x32xf32> -> vector<8x32xf32>
      %c0_36 = arith.constant 0 : index
      %c0_37 = arith.constant 0 : index
      %58 = vector.load %arg8[%c0_36, %c0_37] : memref<1x32xf32, #tpu.memory_space<vmem>>, vector<1x32xf32>
      %59 = vector.broadcast %58 : vector<1x32xf32> to vector<8x32xf32>
      %60 = arith.addf %57, %59 : vector<8x32xf32>
      %cst_38 = arith.constant dense<0.000000e+00> : vector<8xf32>
      %61 = vector.multi_reduction <add>, %60, %cst_38 [1] : vector<8x32xf32> to vector<8xf32>
      %62 = vector.shape_cast %61 : vector<8xf32> to vector<8x1xf32>
      %cst_39 = arith.constant 3.200000e+01 : f32
      %63 = vector.broadcast %cst_39 : f32 to vector<8x1xf32>
      %64 = arith.divf %62, %63 : vector<8x1xf32>
      %65 = vector.broadcast %64 : vector<8x1xf32> to vector<8x32xf32>
      %66 = arith.subf %60, %65 : vector<8x32xf32>
      %67 = arith.mulf %66, %66 : vector<8x32xf32>
      %cst_40 = arith.constant dense<0.000000e+00> : vector<8xf32>
      %68 = vector.multi_reduction <add>, %67, %cst_40 [1] : vector<8x32xf32> to vector<8xf32>
      %69 = vector.shape_cast %68 : vector<8xf32> to vector<8x1xf32>
      %cst_41 = arith.constant 3.200000e+01 : f32
      %70 = vector.broadcast %cst_41 : f32 to vector<8x1xf32>
      %71 = arith.divf %69, %70 : vector<8x1xf32>
      %72 = vector.broadcast %64 : vector<8x1xf32> to vector<8x32xf32>
      %73 = arith.subf %60, %72 : vector<8x32xf32>
      %cst_42 = arith.constant 9.99999974E-6 : f32
      %74 = vector.broadcast %cst_42 : f32 to vector<8x1xf32>
      %75 = arith.addf %71, %74 : vector<8x1xf32>
      %76 = math.rsqrt %75 : vector<8x1xf32>
      %77 = vector.broadcast %76 : vector<8x1xf32> to vector<8x32xf32>
      %78 = arith.mulf %73, %77 : vector<8x32xf32>
      %cst_43 = arith.constant 0.000000e+00 : f32
      %79 = vector.broadcast %cst_43 : f32 to vector<8x32xf32>
      %80 = arith.cmpf ogt, %78, %79 : vector<8x32xf32>
      %cst_44 = arith.constant 0.00999999977 : f32
      %81 = vector.broadcast %cst_44 : f32 to vector<8x32xf32>
      %82 = arith.mulf %81, %78 : vector<8x32xf32>
      %83 = arith.select %80, %78, %82 : vector<8x32xi1>, vector<8x32xf32>
      %c0_45 = arith.constant 0 : index
      %c0_46 = arith.constant 0 : index
      %84 = vector.load %arg9[%c0_45, %c0_46] : memref<32x32xf32, #tpu.memory_space<vmem>>, vector<32x32xf32>
      %cst_47 = arith.constant dense<0.000000e+00> : vector<8x32xf32>
      %85 = tpu.matmul %83, %84, %cst_47 {dimension_numbers = #tpu.dot_dimension_numbers<[1], [0], [0], [1], [0, 0, 1, 1], [], []>} : vector<8x32xf32>, vector<32x32xf32>, vector<8x32xf32> -> vector<8x32xf32>
      %c0_48 = arith.constant 0 : index
      %c0_49 = arith.constant 0 : index
      %86 = vector.load %arg10[%c0_48, %c0_49] : memref<1x32xf32, #tpu.memory_space<vmem>>, vector<1x32xf32>
      %87 = vector.broadcast %86 : vector<1x32xf32> to vector<8x32xf32>
      %88 = arith.addf %85, %87 : vector<8x32xf32>
      %89 = vector.extract_strided_slice %88 {offsets = [0, 0], sizes = [8, 16], strides = [1, 1]} : vector<8x32xf32> to vector<8x16xf32>
      %90 = vector.extract_strided_slice %88 {offsets = [0, 16], sizes = [8, 16], strides = [1, 1]} : vector<8x32xf32> to vector<8x16xf32>
      %c0_50 = arith.constant 0 : index
      %c0_51 = arith.constant 0 : index
      %91 = vector.load %arg3[%c0_50, %c0_51] : memref<8x16xf32, #tpu.memory_space<vmem>>, vector<8x16xf32>
      %cst_52 = arith.constant 5.000000e-01 : f32
      %92 = vector.broadcast %cst_52 : f32 to vector<8x16xf32>
      %93 = arith.mulf %92, %90 : vector<8x16xf32>
      %94 = math.exp %93 : vector<8x16xf32>
      %95 = arith.mulf %91, %94 : vector<8x16xf32>
      %96 = arith.addf %89, %95 : vector<8x16xf32>
      %c0_53 = arith.constant 0 : index
      %c0_54 = arith.constant 0 : index
      %97 = vector.load %arg4[%c0_53, %c0_54] : memref<8x1xf32, #tpu.memory_space<vmem>>, vector<8x1xf32>
      %c0_55 = arith.constant 0 : index
      %c0_56 = arith.constant 0 : index
      %98 = vector.load %arg11[%c0_55, %c0_56] : memref<1x16xf32, #tpu.memory_space<vmem>>, vector<1x16xf32>
      %99 = vector.broadcast %97 : vector<8x1xf32> to vector<8x16xf32>
      %100 = vector.broadcast %98 : vector<1x16xf32> to vector<8x16xf32>
      %101 = arith.mulf %99, %100 : vector<8x16xf32>
      %c0_57 = arith.constant 0 : index
      %c0_58 = arith.constant 0 : index
      %102 = vector.load %arg12[%c0_57, %c0_58] : memref<1x16xf32, #tpu.memory_space<vmem>>, vector<1x16xf32>
      %103 = vector.broadcast %102 : vector<1x16xf32> to vector<8x16xf32>
      %104 = arith.addf %101, %103 : vector<8x16xf32>
      %cst_59 = arith.constant dense<0.000000e+00> : vector<8xf32>
      %105 = vector.multi_reduction <add>, %104, %cst_59 [1] : vector<8x16xf32> to vector<8xf32>
      %106 = vector.shape_cast %105 : vector<8xf32> to vector<8x1xf32>
      %cst_60 = arith.constant 1.600000e+01 : f32
      %107 = vector.broadcast %cst_60 : f32 to vector<8x1xf32>
      %108 = arith.divf %106, %107 : vector<8x1xf32>
      %109 = vector.broadcast %108 : vector<8x1xf32> to vector<8x16xf32>
      %110 = arith.subf %104, %109 : vector<8x16xf32>
      %111 = arith.mulf %110, %110 : vector<8x16xf32>
      %cst_61 = arith.constant dense<0.000000e+00> : vector<8xf32>
      %112 = vector.multi_reduction <add>, %111, %cst_61 [1] : vector<8x16xf32> to vector<8xf32>
      %113 = vector.shape_cast %112 : vector<8xf32> to vector<8x1xf32>
      %cst_62 = arith.constant 1.600000e+01 : f32
      %114 = vector.broadcast %cst_62 : f32 to vector<8x1xf32>
      %115 = arith.divf %113, %114 : vector<8x1xf32>
      %116 = vector.broadcast %108 : vector<8x1xf32> to vector<8x16xf32>
      %117 = arith.subf %104, %116 : vector<8x16xf32>
      %cst_63 = arith.constant 9.99999974E-6 : f32
      %118 = vector.broadcast %cst_63 : f32 to vector<8x1xf32>
      %119 = arith.addf %115, %118 : vector<8x1xf32>
      %120 = math.rsqrt %119 : vector<8x1xf32>
      %121 = vector.broadcast %120 : vector<8x1xf32> to vector<8x16xf32>
      %122 = arith.mulf %117, %121 : vector<8x16xf32>
      %cst_64 = arith.constant 0.000000e+00 : f32
      %123 = vector.broadcast %cst_64 : f32 to vector<8x16xf32>
      %124 = arith.cmpf ogt, %122, %123 : vector<8x16xf32>
      %cst_65 = arith.constant 0.00999999977 : f32
      %125 = vector.broadcast %cst_65 : f32 to vector<8x16xf32>
      %126 = arith.mulf %125, %122 : vector<8x16xf32>
      %127 = arith.select %124, %122, %126 : vector<8x16xi1>, vector<8x16xf32>
      %c0_66 = arith.constant 0 : index
      %c0_67 = arith.constant 0 : index
      %128 = vector.load %arg13[%c0_66, %c0_67] : memref<16x16xf32, #tpu.memory_space<vmem>>, vector<16x16xf32>
      %cst_68 = arith.constant dense<0.000000e+00> : vector<8x16xf32>
      %129 = tpu.matmul %127, %128, %cst_68 {dimension_numbers = #tpu.dot_dimension_numbers<[1], [0], [0], [1], [0, 0, 1, 1], [], []>} : vector<8x16xf32>, vector<16x16xf32>, vector<8x16xf32> -> vector<8x16xf32>
      %c0_69 = arith.constant 0 : index
      %c0_70 = arith.constant 0 : index
      %130 = vector.load %arg14[%c0_69, %c0_70] : memref<1x16xf32, #tpu.memory_space<vmem>>, vector<1x16xf32>
      %131 = vector.broadcast %130 : vector<1x16xf32> to vector<8x16xf32>
      %132 = arith.addf %129, %131 : vector<8x16xf32>
      %cst_71 = arith.constant dense<0.000000e+00> : vector<8xf32>
      %133 = vector.multi_reduction <add>, %132, %cst_71 [1] : vector<8x16xf32> to vector<8xf32>
      %134 = vector.shape_cast %133 : vector<8xf32> to vector<8x1xf32>
      %cst_72 = arith.constant 1.600000e+01 : f32
      %135 = vector.broadcast %cst_72 : f32 to vector<8x1xf32>
      %136 = arith.divf %134, %135 : vector<8x1xf32>
      %137 = vector.broadcast %136 : vector<8x1xf32> to vector<8x16xf32>
      %138 = arith.subf %132, %137 : vector<8x16xf32>
      %139 = arith.mulf %138, %138 : vector<8x16xf32>
      %cst_73 = arith.constant dense<0.000000e+00> : vector<8xf32>
      %140 = vector.multi_reduction <add>, %139, %cst_73 [1] : vector<8x16xf32> to vector<8xf32>
      %141 = vector.shape_cast %140 : vector<8xf32> to vector<8x1xf32>
      %cst_74 = arith.constant 1.600000e+01 : f32
      %142 = vector.broadcast %cst_74 : f32 to vector<8x1xf32>
      %143 = arith.divf %141, %142 : vector<8x1xf32>
      %144 = vector.broadcast %136 : vector<8x1xf32> to vector<8x16xf32>
      %145 = arith.subf %132, %144 : vector<8x16xf32>
      %cst_75 = arith.constant 9.99999974E-6 : f32
      %146 = vector.broadcast %cst_75 : f32 to vector<8x1xf32>
      %147 = arith.addf %143, %146 : vector<8x1xf32>
      %148 = math.rsqrt %147 : vector<8x1xf32>
      %149 = vector.broadcast %148 : vector<8x1xf32> to vector<8x16xf32>
      %150 = arith.mulf %145, %149 : vector<8x16xf32>
      %cst_76 = arith.constant 0.000000e+00 : f32
      %151 = vector.broadcast %cst_76 : f32 to vector<8x16xf32>
      %152 = arith.cmpf ogt, %150, %151 : vector<8x16xf32>
      %cst_77 = arith.constant 0.00999999977 : f32
      %153 = vector.broadcast %cst_77 : f32 to vector<8x16xf32>
      %154 = arith.mulf %153, %150 : vector<8x16xf32>
      %155 = arith.select %152, %150, %154 : vector<8x16xi1>, vector<8x16xf32>
      %c0_78 = arith.constant 0 : index
      %c0_79 = arith.constant 0 : index
      %156 = vector.load %arg15[%c0_78, %c0_79] : memref<16x64xf32, #tpu.memory_space<vmem>>, vector<16x64xf32>
      %cst_80 = arith.constant dense<0.000000e+00> : vector<8x64xf32>
      %157 = tpu.matmul %89, %156, %cst_80 {dimension_numbers = #tpu.dot_dimension_numbers<[1], [0], [0], [1], [0, 0, 1, 1], [], []>} : vector<8x16xf32>, vector<16x64xf32>, vector<8x64xf32> -> vector<8x64xf32>
      %c0_81 = arith.constant 0 : index
      %c0_82 = arith.constant 0 : index
      %158 = vector.load %arg16[%c0_81, %c0_82] : memref<1x64xf32, #tpu.memory_space<vmem>>, vector<1x64xf32>
      %159 = vector.broadcast %158 : vector<1x64xf32> to vector<8x64xf32>
      %160 = arith.addf %157, %159 : vector<8x64xf32>
      %cst_83 = arith.constant dense<0.000000e+00> : vector<8xf32>
      %161 = vector.multi_reduction <add>, %160, %cst_83 [1] : vector<8x64xf32> to vector<8xf32>
      %162 = vector.shape_cast %161 : vector<8xf32> to vector<8x1xf32>
      %cst_84 = arith.constant 6.400000e+01 : f32
      %163 = vector.broadcast %cst_84 : f32 to vector<8x1xf32>
      %164 = arith.divf %162, %163 : vector<8x1xf32>
      %165 = vector.broadcast %164 : vector<8x1xf32> to vector<8x64xf32>
      %166 = arith.subf %160, %165 : vector<8x64xf32>
      %167 = arith.mulf %166, %166 : vector<8x64xf32>
      %cst_85 = arith.constant dense<0.000000e+00> : vector<8xf32>
      %168 = vector.multi_reduction <add>, %167, %cst_85 [1] : vector<8x64xf32> to vector<8xf32>
      %169 = vector.shape_cast %168 : vector<8xf32> to vector<8x1xf32>
      %cst_86 = arith.constant 6.400000e+01 : f32
      %170 = vector.broadcast %cst_86 : f32 to vector<8x1xf32>
      %171 = arith.divf %169, %170 : vector<8x1xf32>
      %172 = vector.broadcast %164 : vector<8x1xf32> to vector<8x64xf32>
      %173 = arith.subf %160, %172 : vector<8x64xf32>
      %cst_87 = arith.constant 9.99999974E-6 : f32
      %174 = vector.broadcast %cst_87 : f32 to vector<8x1xf32>
      %175 = arith.addf %171, %174 : vector<8x1xf32>
      %176 = math.rsqrt %175 : vector<8x1xf32>
      %177 = vector.broadcast %176 : vector<8x1xf32> to vector<8x64xf32>
      %178 = arith.mulf %173, %177 : vector<8x64xf32>
      %cst_88 = arith.constant 0.000000e+00 : f32
      %179 = vector.broadcast %cst_88 : f32 to vector<8x64xf32>
      %180 = arith.cmpf ogt, %178, %179 : vector<8x64xf32>
      %cst_89 = arith.constant 0.00999999977 : f32
      %181 = vector.broadcast %cst_89 : f32 to vector<8x64xf32>
      %182 = arith.mulf %181, %178 : vector<8x64xf32>
      %183 = arith.select %180, %178, %182 : vector<8x64xi1>, vector<8x64xf32>
      %c0_90 = arith.constant 0 : index
      %c0_91 = arith.constant 0 : index
      %184 = vector.load %arg17[%c0_90, %c0_91] : memref<64x32xf32, #tpu.memory_space<vmem>>, vector<64x32xf32>
      %cst_92 = arith.constant dense<0.000000e+00> : vector<8x32xf32>
      %185 = tpu.matmul %183, %184, %cst_92 {dimension_numbers = #tpu.dot_dimension_numbers<[1], [0], [0], [1], [0, 0, 1, 1], [], []>} : vector<8x64xf32>, vector<64x32xf32>, vector<8x32xf32> -> vector<8x32xf32>
      %c0_93 = arith.constant 0 : index
      %c0_94 = arith.constant 0 : index
      %186 = vector.load %arg18[%c0_93, %c0_94] : memref<1x32xf32, #tpu.memory_space<vmem>>, vector<1x32xf32>
      %187 = vector.broadcast %186 : vector<1x32xf32> to vector<8x32xf32>
      %188 = arith.addf %185, %187 : vector<8x32xf32>
      %cst_95 = arith.constant dense<0.000000e+00> : vector<8xf32>
      %189 = vector.multi_reduction <add>, %188, %cst_95 [1] : vector<8x32xf32> to vector<8xf32>
      %190 = vector.shape_cast %189 : vector<8xf32> to vector<8x1xf32>
      %cst_96 = arith.constant 3.200000e+01 : f32
      %191 = vector.broadcast %cst_96 : f32 to vector<8x1xf32>
      %192 = arith.divf %190, %191 : vector<8x1xf32>
      %193 = vector.broadcast %192 : vector<8x1xf32> to vector<8x32xf32>
      %194 = arith.subf %188, %193 : vector<8x32xf32>
      %195 = arith.mulf %194, %194 : vector<8x32xf32>
      %cst_97 = arith.constant dense<0.000000e+00> : vector<8xf32>
      %196 = vector.multi_reduction <add>, %195, %cst_97 [1] : vector<8x32xf32> to vector<8xf32>
      %197 = vector.shape_cast %196 : vector<8xf32> to vector<8x1xf32>
      %cst_98 = arith.constant 3.200000e+01 : f32
      %198 = vector.broadcast %cst_98 : f32 to vector<8x1xf32>
      %199 = arith.divf %197, %198 : vector<8x1xf32>
      %200 = vector.broadcast %192 : vector<8x1xf32> to vector<8x32xf32>
      %201 = arith.subf %188, %200 : vector<8x32xf32>
      %cst_99 = arith.constant 9.99999974E-6 : f32
      %202 = vector.broadcast %cst_99 : f32 to vector<8x1xf32>
      %203 = arith.addf %199, %202 : vector<8x1xf32>
      %204 = math.rsqrt %203 : vector<8x1xf32>
      %205 = vector.broadcast %204 : vector<8x1xf32> to vector<8x32xf32>
      %206 = arith.mulf %201, %205 : vector<8x32xf32>
      %cst_100 = arith.constant 0.000000e+00 : f32
      %207 = vector.broadcast %cst_100 : f32 to vector<8x32xf32>
      %208 = arith.cmpf ogt, %206, %207 : vector<8x32xf32>
      %cst_101 = arith.constant 0.00999999977 : f32
      %209 = vector.broadcast %cst_101 : f32 to vector<8x32xf32>
      %210 = arith.mulf %209, %206 : vector<8x32xf32>
      %211 = arith.select %208, %206, %210 : vector<8x32xi1>, vector<8x32xf32>
      %c0_102 = arith.constant 0 : index
      %c0_103 = arith.constant 0 : index
      %212 = vector.load %arg19[%c0_102, %c0_103] : memref<32x6xf32, #tpu.memory_space<vmem>>, vector<32x6xf32>
      %cst_104 = arith.constant dense<0.000000e+00> : vector<8x6xf32>
      %213 = tpu.matmul %211, %212, %cst_104 {dimension_numbers = #tpu.dot_dimension_numbers<[1], [0], [0], [1], [0, 0, 1, 1], [], []>} : vector<8x32xf32>, vector<32x6xf32>, vector<8x6xf32> -> vector<8x6xf32>
      %c0_105 = arith.constant 0 : index
      %c0_106 = arith.constant 0 : index
      %214 = vector.load %arg20[%c0_105, %c0_106] : memref<1x6xf32, #tpu.memory_space<vmem>>, vector<1x6xf32>
      %215 = vector.broadcast %214 : vector<1x6xf32> to vector<8x6xf32>
      %216 = arith.addf %213, %215 : vector<8x6xf32>
      %217 = tpu.concatenate %96, %155 in 1 : vector<8x16xf32>, vector<8x16xf32> -> vector<8x32xf32>
      %c0_107 = arith.constant 0 : index
      %c0_108 = arith.constant 0 : index
      %218 = vector.load %arg21[%c0_107, %c0_108] : memref<32x32xf32, #tpu.memory_space<vmem>>, vector<32x32xf32>
      %cst_109 = arith.constant dense<0.000000e+00> : vector<8x32xf32>
      %219 = tpu.matmul %217, %218, %cst_109 {dimension_numbers = #tpu.dot_dimension_numbers<[1], [0], [0], [1], [0, 0, 1, 1], [], []>} : vector<8x32xf32>, vector<32x32xf32>, vector<8x32xf32> -> vector<8x32xf32>
      %c0_110 = arith.constant 0 : index
      %c0_111 = arith.constant 0 : index
      %220 = vector.load %arg22[%c0_110, %c0_111] : memref<1x32xf32, #tpu.memory_space<vmem>>, vector<1x32xf32>
      %221 = vector.broadcast %220 : vector<1x32xf32> to vector<8x32xf32>
      %222 = arith.addf %219, %221 : vector<8x32xf32>
      %c0_112 = arith.constant 0 : index
      %c0_113 = arith.constant 0 : index
      %223 = vector.load %arg23[%c0_112, %c0_113] : memref<16x96xf32, #tpu.memory_space<vmem>>, vector<16x96xf32>
      %cst_114 = arith.constant dense<0.000000e+00> : vector<8x96xf32>
      %224 = tpu.matmul %155, %223, %cst_114 {dimension_numbers = #tpu.dot_dimension_numbers<[1], [0], [0], [1], [0, 0, 1, 1], [], []>} : vector<8x16xf32>, vector<16x96xf32>, vector<8x96xf32> -> vector<8x96xf32>
      %c0_115 = arith.constant 0 : index
      %c0_116 = arith.constant 0 : index
      %225 = vector.load %arg24[%c0_115, %c0_116] : memref<1x96xf32, #tpu.memory_space<vmem>>, vector<1x96xf32>
      %226 = vector.broadcast %225 : vector<1x96xf32> to vector<8x96xf32>
      %227 = arith.addf %224, %226 : vector<8x96xf32>
      %cst_117 = arith.constant 0.000000e+00 : f32
      %228 = vector.broadcast %cst_117 : f32 to vector<8x90xf32>
      %229 = tpu.concatenate %89, %90, %216, %222, %227, %228 in 1 : vector<8x16xf32>, vector<8x16xf32>, vector<8x6xf32>, vector<8x32xf32>, vector<8x96xf32>, vector<8x90xf32> -> vector<8x256xf32>
      %c0_118 = arith.constant 0 : index
      %c0_119 = arith.constant 0 : index
      %230 = vector.load %arg25[%c0_118, %c0_119] : memref<8x256xf32, #tpu.memory_space<vmem>>, vector<8x256xf32>
      tpu.vector_store %arg25[%c0_118, %c0_119], %229 {strides = array<i32>} : memref<8x256xf32, #tpu.memory_space<vmem>>, vector<8x256xf32>,
    } else {
    }
    return
  }
  func.func @transform_0(%arg0: i32) -> (i32, i32, i32) {
    %c0_i32 = arith.constant 0 : i32
    %c0_i32_0 = arith.constant 0 : i32
    %c0_i32_1 = arith.constant 0 : i32
    return %c0_i32, %arg0, %c0_i32_0 : i32, i32, i32
  }
  func.func @transform_1(%arg0: i32) -> (i32, i32) {
    %c0_i32 = arith.constant 0 : i32
    %c0_i32_0 = arith.constant 0 : i32
    return %c0_i32, %arg0 : i32, i32
  }
  func.func @transform_2(%arg0: i32) -> (i32, i32) {
    %c0_i32 = arith.constant 0 : i32
    %c0_i32_0 = arith.constant 0 : i32
    %c0_i32_1 = arith.constant 0 : i32
    return %c0_i32, %c0_i32_0 : i32, i32
  }
  func.func @transform_3(%arg0: i32) -> (i32, i32) {
    %c0_i32 = arith.constant 0 : i32
    %c0_i32_0 = arith.constant 0 : i32
    %c0_i32_1 = arith.constant 0 : i32
    return %c0_i32, %c0_i32_0 : i32, i32
  }
  func.func @transform_4(%arg0: i32) -> (i32, i32) {
    %c0_i32 = arith.constant 0 : i32
    %c0_i32_0 = arith.constant 0 : i32
    %c0_i32_1 = arith.constant 0 : i32
    return %c0_i32, %c0_i32_0 : i32, i32
  }
  func.func @transform_5(%arg0: i32) -> (i32, i32) {
    %c0_i32 = arith.constant 0 : i32
    %c0_i32_0 = arith.constant 0 : i32
    %c0_i32_1 = arith.constant 0 : i32
    return %c0_i32, %c0_i32_0 : i32, i32
  }
  func.func @transform_6(%arg0: i32) -> (i32, i32) {
    %c0_i32 = arith.constant 0 : i32
    %c0_i32_0 = arith.constant 0 : i32
    %c0_i32_1 = arith.constant 0 : i32
    return %c0_i32, %c0_i32_0 : i32, i32
  }
  func.func @transform_7(%arg0: i32) -> (i32, i32) {
    %c0_i32 = arith.constant 0 : i32
    %c0_i32_0 = arith.constant 0 : i32
    %c0_i32_1 = arith.constant 0 : i32
    return %c0_i32, %c0_i32_0 : i32, i32
  }
  func.func @transform_8(%arg0: i32) -> (i32, i32) {
    %c0_i32 = arith.constant 0 : i32
    %c0_i32_0 = arith.constant 0 : i32
    %c0_i32_1 = arith.constant 0 : i32
    return %c0_i32, %c0_i32_0 : i32, i32
  }
  func.func @transform_9(%arg0: i32) -> (i32, i32) {
    %c0_i32 = arith.constant 0 : i32
    %c0_i32_0 = arith.constant 0 : i32
    %c0_i32_1 = arith.constant 0 : i32
    return %c0_i32, %c0_i32_0 : i32, i32
  }
  func.func @transform_10(%arg0: i32) -> (i32, i32) {
    %c0_i32 = arith.constant 0 : i32
    %c0_i32_0 = arith.constant 0 : i32
    %c0_i32_1 = arith.constant 0 : i32
    return %c0_i32, %c0_i32_0 : i32, i32
  }
  func.func @transform_11(%arg0: i32) -> (i32, i32) {
    %c0_i32 = arith.constant 0 : i32
    %c0_i32_0 = arith.constant 0 : i32
    %c0_i32_1 = arith.constant 0 : i32
    return %c0_i32, %c0_i32_0 : i32, i32
  }
  func.func @transform_12(%arg0: i32) -> (i32, i32) {
    %c0_i32 = arith.constant 0 : i32
    %c0_i32_0 = arith.constant 0 : i32
    %c0_i32_1 = arith.constant 0 : i32
    return %c0_i32, %c0_i32_0 : i32, i32
  }
  func.func @transform_13(%arg0: i32) -> (i32, i32) {
    %c0_i32 = arith.constant 0 : i32
    %c0_i32_0 = arith.constant 0 : i32
    %c0_i32_1 = arith.constant 0 : i32
    return %c0_i32, %c0_i32_0 : i32, i32
  }
  func.func @transform_14(%arg0: i32) -> (i32, i32) {
    %c0_i32 = arith.constant 0 : i32
    %c0_i32_0 = arith.constant 0 : i32
    %c0_i32_1 = arith.constant 0 : i32
    return %c0_i32, %c0_i32_0 : i32, i32
  }
  func.func @transform_15(%arg0: i32) -> (i32, i32) {
    %c0_i32 = arith.constant 0 : i32
    %c0_i32_0 = arith.constant 0 : i32
    %c0_i32_1 = arith.constant 0 : i32
    return %c0_i32, %c0_i32_0 : i32, i32
  }
  func.func @transform_16(%arg0: i32) -> (i32, i32) {
    %c0_i32 = arith.constant 0 : i32
    %c0_i32_0 = arith.constant 0 : i32
    %c0_i32_1 = arith.constant 0 : i32
    return %c0_i32, %c0_i32_0 : i32, i32
  }
  func.func @transform_17(%arg0: i32) -> (i32, i32) {
    %c0_i32 = arith.constant 0 : i32
    %c0_i32_0 = arith.constant 0 : i32
    %c0_i32_1 = arith.constant 0 : i32
    return %c0_i32, %c0_i32_0 : i32, i32
  }
  func.func @transform_18(%arg0: i32) -> (i32, i32) {
    %c0_i32 = arith.constant 0 : i32
    %c0_i32_0 = arith.constant 0 : i32
    %c0_i32_1 = arith.constant 0 : i32
    return %c0_i32, %c0_i32_0 : i32, i32
  }
  func.func @transform_19(%arg0: i32) -> (i32, i32) {
    %c0_i32 = arith.constant 0 : i32
    %c0_i32_0 = arith.constant 0 : i32
    %c0_i32_1 = arith.constant 0 : i32
    return %c0_i32, %c0_i32_0 : i32, i32
  }
  func.func @transform_20(%arg0: i32) -> (i32, i32) {
    %c0_i32 = arith.constant 0 : i32
    %c0_i32_0 = arith.constant 0 : i32
    %c0_i32_1 = arith.constant 0 : i32
    return %c0_i32, %c0_i32_0 : i32, i32
  }
  func.func @transform_21(%arg0: i32) -> (i32, i32) {
    %c0_i32 = arith.constant 0 : i32
    %c0_i32_0 = arith.constant 0 : i32
    %c0_i32_1 = arith.constant 0 : i32
    return %c0_i32, %c0_i32_0 : i32, i32
  }
  func.func @transform_22(%arg0: i32) -> (i32, i32) {
    %c0_i32 = arith.constant 0 : i32
    %c0_i32_0 = arith.constant 0 : i32
    %c0_i32_1 = arith.constant 0 : i32
    return %c0_i32, %c0_i32_0 : i32, i32
  }
  func.func @transform_23(%arg0: i32) -> (i32, i32) {
    %c0_i32 = arith.constant 0 : i32
    %c0_i32_0 = arith.constant 0 : i32
    %c0_i32_1 = arith.constant 0 : i32
    return %c0_i32, %c0_i32_0 : i32, i32
  }
  func.func @transform_24(%arg0: i32) -> (i32, i32) {
    %c0_i32 = arith.constant 0 : i32
    %c0_i32_0 = arith.constant 0 : i32
    %c0_i32_1 = arith.constant 0 : i32
    return %c0_i32, %c0_i32_0 : i32, i32
  }
}

</mosaic_0001>

<bundles_post_ra>
// kernel: tpu_custom_call.1
= control target key start
LH: loop header
LB: loop body
LE: loop exit
PB: predicated region body
PF: predicated region fallthrough
CT: control target
= control target key end

     0   :  { %s2189_s0 = inlined_call_operand.vmem [shape: f32[8,8,32], index: 0, kind: input, shape index: {}]   ;;  %s2190_s1 = inlined_call_operand.hbm [shape: f32[8,8], index: 1, kind: input, shape index: {}]   ;;  %s2191_s2 = inlined_call_operand.hbm [shape: f32[8,16], index: 2, kind: input, shape index: {}]   ;;  %s2192_s3 = inlined_call_operand.vmem [shape: f32[8,1], index: 3, kind: input, shape index: {}]   ;;  %s2193_s4 = inlined_call_operand.vmem [shape: bf16[32,64], index: 4, kind: input, shape index: {}]   ;;  %s2194_s5 = inlined_call_operand.vmem [shape: f32[1,64], index: 5, kind: input, shape index: {}]   ;;  %s2195_s6 = inlined_call_operand.vmem [shape: bf16[64,32], index: 6, kind: input, shape index: {}]   ;;  %s2196_s7 = inlined_call_operand.hbm [shape: f32[1,32], index: 7, kind: input, shape index: {}]   ;;  %s2197_s8 = inlined_call_operand.vmem [shape: f32[32,32], index: 8, kind: input, shape index: {}]   ;;  %s2198_s9 = inlined_call_operand.hbm [shape: f32[1,32], index: 9, kind: input, shape index: {}]   ;;  %s2199_s10 = inlined_call_operand.hbm [shape: f32[1,16], index: 10, kind: input, shape index: {}]   ;;  %s2200_s11 = inlined_call_operand.hbm [shape: f32[1,16], index: 11, kind: input, shape index: {}]   ;;  %s2201_s12 = inlined_call_operand.vmem [shape: f32[16,16], index: 12, kind: input, shape index: {}]   ;;  %s2202_s13 = inlined_call_operand.hbm [shape: f32[1,16], index: 13, kind: input, shape index: {}]   ;;  %s2203_s14 = inlined_call_operand.vmem [shape: f32[16,64], index: 14, kind: input, shape index: {}]   ;;  %s2204_s15 = inlined_call_operand.hbm [shape: f32[1,64], index: 15, kind: input, shape index: {}]   ;;  %s2205_s16 = inlined_call_operand.vmem [shape: f32[64,32], index: 16, kind: input, shape index: {}]   ;;  %s2206_s17 = inlined_call_operand.vmem [shape: f32[1,32], index: 17, kind: input, shape index: {}]   ;;  %s2207_s18 = inlined_call_operand.vmem [shape: f32[32,6], index: 18, kind: input, shape index: {}]   ;;  %s2208_s19 = inlined_call_operand.vmem [shape: f32[1,6], index: 19, kind: input, shape index: {}]   ;;  %s2209_s20 = inlined_call_operand.vmem [shape: f32[32,32], index: 20, kind: input, shape index: {}]   ;;  %s2210_s21 = inlined_call_operand.vmem [shape: f32[1,32], index: 21, kind: input, shape index: {}]   ;;  %s2211_s22 = inlined_call_operand.vmem [shape: f32[16,96], index: 22, kind: input, shape index: {}]   ;;  %s2212_s23 = inlined_call_operand.vmem [shape: f32[1,96], index: 23, kind: input, shape index: {}]   ;;  %s2213_s24 = inlined_call_operand.hbm [shape: f32[8,256], index: 24, kind: output, shape index: {}]  }
   0x1   :  { %2221 = sst [smem:[#allocation25_spill]] %s2189_s0 }
   0x2   :  { %2222 = sst [smem:[#allocation26_spill]] %s2190_s1 }
   0x3   :  { %2223 = sst [smem:[#allocation27_spill]] %s2191_s2 }
   0x4   :  { %2224 = sst [smem:[#allocation28_spill]] %s2192_s3 }
   0x5   :  { %2225 = sst [smem:[#allocation29_spill]] %s2193_s4 }
   0x6   :  { %2226 = sst [smem:[#allocation30_spill]] %s2194_s5 }
   0x7   :  { %2227 = sst [smem:[#allocation31_spill]] %s2195_s6 }
   0x8   :  { %2228 = sst [smem:[#allocation32_spill]] %s2196_s7 }
   0x9   :  { %2229 = sst [smem:[#allocation33_spill]] %s2197_s8 }
   0xa   :  { %29 = vsyncpa [#allocation5], 0 }
   0xb   :  { %30 = vsyncpa [#allocation8], 0 }
   0xc   :  { %31 = vsyncpa [#allocation11], 0 }
   0xd   :  { %32 = vsyncpa [#allocation14], 0 }
   0xe   :  { %33 = vsyncpa [#allocation17], 0 }
   0xf   :  { %34 = vsyncpa [#allocation6], 0  ;;  %s1720_s5 = smov [#allocation7]   ;;  %s1721_s27 = smov [#allocation10]  }
  0x10   :  { %s53_s26 = sshll.u32 %s1720_s5, 4  ;;  %s83_s28 = sshll.u32 %s1721_s27, 4  ;;  %s54_s26 = int_to_ptr.vmem [resolvable:$true] %s53_s26  ;;  %s84_s28 = int_to_ptr.vmem [resolvable:$true] %s83_s28 }
  0x11   :  { %s2230_s29 = sld [smem:[#allocation27_spill]] }
  0x17   :  { %s1510_s0 = scalar_lea.hbm %s2230_s29, 128 }
  0x18   :  { %p1511_p0 = scmp.ne.s32.totalorder %s2230_s29, %s1510_s0  ;;  %p1514_p1 = scmp.lt.u32.totalorder %s1510_s0, %s2230_s29 }
  0x1a   :  { %p1516_p2 = pnand %p1514_p1, %p1511_p0 }
  0x1c   :  { %1519 = shalt.err (!%p1516_p2)
}
  0x1d   :  { %s1520_s8 = scalar_lea.vmem %s54_s26, 128  ;;  %p1525_p4 = scmp.lt.s32.totalorder %s54_s26, %s54_s26 }
  0x1e   :  { %p1521_p3 = scmp.ne.s32.totalorder %s54_s26, %s1520_s8  ;;  %p1526_p5 = scmp.lt.s32.totalorder %s1520_s8, %s1520_s8 }
  0x20   :  { %p1527_p6 = por %p1526_p5, %p1525_p4 }
  0x22   :  { %p1528_p7 = pnand %p1527_p6, %p1521_p3 }
  0x24   :  { %1531 = shalt.err (!%p1528_p7)
}
  0x25   :  { %56 = dma.hbm_to_vmem [thread:$0]  %s2230_s29, 128, %s54_s26, [#allocation8]  }
  0x26   :  { %s1532_s6 = scalar_lea.hbm %s2198_s9, 16 }
  0x27   :  { %p1533_p8 = scmp.ne.s32.totalorder %s2198_s9, %s1532_s6  ;;  %p1536_p9 = scmp.lt.u32.totalorder %s1532_s6, %s2198_s9 }
  0x29   :  { %p1538_p10 = pnand %p1536_p9, %p1533_p8 }
  0x2b   :  { %1541 = shalt.err (!%p1538_p10)
}
  0x2c   :  { %s1542_s3 = scalar_lea.vmem %s84_s28, 16  ;;  %s1546_s25 = scalar_lea.vmem %s84_s28, 32 }
  0x2d   :  { %p1543_p11 = scmp.ne.s32.totalorder %s84_s28, %s1542_s3  ;;  %p1547_p12 = scmp.lt.s32.totalorder %s84_s28, %s84_s28 }
  0x2e   :  { %p1548_p13 = scmp.lt.s32.totalorder %s1546_s25, %s1542_s3 }
  0x30   :  { %p1549_p0 = por %p1548_p13, %p1547_p12 }
  0x32   :  { %p1550_p1 = pnand %p1549_p0, %p1543_p11 }
  0x34   :  { %1553 = shalt.err (!%p1550_p1)
}
  0x35   :  { %86 = dma.hbm_to_vmem [thread:$0]  %s2198_s9, 16, %s84_s28, [#allocation11]  }
  0x36   :  { %s1722_s8 = smov [#allocation13]   ;;  %s1723_s1 = smov [#allocation4]  }
  0x37   :  { %s103_s4 = sshll.u32 %s1722_s8, 4  ;;  %s43_s5 = sshll.u32 %s1723_s1, 4  ;;  %s104_s4 = int_to_ptr.vmem [resolvable:$true] %s103_s4  ;;  %s44_s5 = int_to_ptr.vmem [resolvable:$true] %s43_s5 }
  0x38   :  { %s1554_s2 = scalar_lea.hbm %s2200_s11, 16 }
  0x39   :  { %p1555_p2 = scmp.ne.s32.totalorder %s2200_s11, %s1554_s2  ;;  %p1558_p3 = scmp.lt.u32.totalorder %s1554_s2, %s2200_s11 }
  0x3b   :  { %p1560_p4 = pnand %p1558_p3, %p1555_p2 }
  0x3d   :  { %1563 = shalt.err (!%p1560_p4)
}
  0x3e   :  { %s1564_s9 = scalar_lea.vmem %s104_s4, 16  ;;  %s1568_s28 = scalar_lea.vmem %s104_s4, 32 }
  0x3f   :  { %p1565_p5 = scmp.ne.s32.totalorder %s104_s4, %s1564_s9  ;;  %p1569_p6 = scmp.lt.s32.totalorder %s104_s4, %s104_s4 }
  0x40   :  { %p1570_p7 = scmp.lt.s32.totalorder %s1568_s28, %s1564_s9 }
  0x42   :  { %p1571_p8 = por %p1570_p7, %p1569_p6 }
  0x44   :  { %p1572_p9 = pnand %p1571_p8, %p1565_p5 }
  0x46   :  { %1575 = shalt.err (!%p1572_p9)
}
  0x47   :  { %106 = dma.hbm_to_vmem [thread:$0]  %s2200_s11, 16, %s104_s4, [#allocation14]  }
  0x48   :  { %s2231_s1 = sld [smem:[#allocation26_spill]] }
  0x4e   :  { %s1576_s27 = scalar_lea.hbm %s2231_s1, 128 }
  0x4f   :  { %p1577_p10 = scmp.ne.s32.totalorder %s2231_s1, %s1576_s27  ;;  %p1580_p11 = scmp.lt.u32.totalorder %s1576_s27, %s2231_s1 }
  0x51   :  { %p1582_p12 = pnand %p1580_p11, %p1577_p10 }
  0x53   :  { %1585 = shalt.err (!%p1582_p12)
}
  0x54   :  { %s1586_s30 = scalar_lea.vmem %s44_s5, 128  ;;  %p1591_p0 = scmp.lt.s32.totalorder %s44_s5, %s44_s5 }
  0x55   :  { %p1587_p13 = scmp.ne.s32.totalorder %s44_s5, %s1586_s30  ;;  %p1592_p1 = scmp.lt.s32.totalorder %s1586_s30, %s1586_s30 }
  0x57   :  { %p1593_p2 = por %p1592_p1, %p1591_p0 }
  0x59   :  { %p1594_p3 = pnand %p1593_p2, %p1587_p13 }
  0x5b   :  { %1597 = shalt.err (!%p1594_p3)
}
  0x5c   :  { %46 = dma.hbm_to_vmem [thread:$0]  %s2231_s1, 128, %s44_s5, [#allocation5]  }
  0x5d   :  { %s1724_s3 = smov [#allocation9]   ;;  %s1725_s28 = smov [#allocation12]  }
  0x5e   :  { %s71_s9 = sshll.u32 %s1724_s3, 4  ;;  %s93_s25 = sshll.u32 %s1725_s28, 4  ;;  %s72_s9 = int_to_ptr.vmem [resolvable:$true] %s71_s9  ;;  %s94_s25 = int_to_ptr.vmem [resolvable:$true] %s93_s25 }
  0x5f   :  { %s2232_s8 = sld [smem:[#allocation32_spill]] }
  0x65   :  { %s1598_s27 = scalar_lea.hbm %s2232_s8, 16 }
  0x66   :  { %p1599_p4 = scmp.ne.s32.totalorder %s2232_s8, %s1598_s27  ;;  %p1602_p5 = scmp.lt.u32.totalorder %s1598_s27, %s2232_s8 }
  0x68   :  { %p1604_p6 = pnand %p1602_p5, %p1599_p4 }
  0x6a   :  { %1607 = shalt.err (!%p1604_p6)
}
  0x6b   :  { %s1608_s5 = scalar_lea.vmem %s72_s9, 16  ;;  %s1612_s1 = scalar_lea.vmem %s72_s9, 32 }
  0x6c   :  { %p1609_p7 = scmp.ne.s32.totalorder %s72_s9, %s1608_s5  ;;  %p1613_p8 = scmp.lt.s32.totalorder %s72_s9, %s72_s9 }
  0x6d   :  { %p1614_p9 = scmp.lt.s32.totalorder %s1612_s1, %s1608_s5 }
  0x6f   :  { %p1615_p10 = por %p1614_p9, %p1613_p8 }
  0x71   :  { %p1616_p11 = pnand %p1615_p10, %p1609_p7 }
  0x73   :  { %1619 = shalt.err (!%p1616_p11)
}
  0x74   :  { %74 = dma.hbm_to_vmem [thread:$0]  %s2232_s8, 16, %s72_s9, [#allocation8]  }
  0x75   :  { %s1620_s28 = scalar_lea.hbm %s2199_s10, 16 }
  0x76   :  { %p1621_p12 = scmp.ne.s32.totalorder %s2199_s10, %s1620_s28  ;;  %p1624_p13 = scmp.lt.u32.totalorder %s1620_s28, %s2199_s10 }
  0x78   :  { %p1626_p0 = pnand %p1624_p13, %p1621_p12 }
  0x7a   :  { %1629 = shalt.err (!%p1626_p0)
}
  0x7b   :  { %s1630_s2 = scalar_lea.vmem %s94_s25, 16  ;;  %s1634_s7 = scalar_lea.vmem %s94_s25, 32 }
  0x7c   :  { %p1631_p1 = scmp.ne.s32.totalorder %s94_s25, %s1630_s2  ;;  %p1635_p2 = scmp.lt.s32.totalorder %s94_s25, %s94_s25 }
  0x7d   :  { %p1636_p3 = scmp.lt.s32.totalorder %s1634_s7, %s1630_s2 }
  0x7f   :  { %p1637_p4 = por %p1636_p3, %p1635_p2 }
  0x81   :  { %p1638_p5 = pnand %p1637_p4, %p1631_p1 }
  0x83   :  { %1641 = shalt.err (!%p1638_p5)
}
  0x84   :  { %96 = dma.hbm_to_vmem [thread:$0]  %s2199_s10, 16, %s94_s25, [#allocation11]  }
  0x85   :  { %s1726_s0 = smov [#allocation15]   ;;  %s1727_s1 = smov [#allocation16]  }
  0x86   :  { %s115_s5 = sshll.u32 %s1726_s0, 4  ;;  %s127_s30 = sshll.u32 %s1727_s1, 4  ;;  %s116_s5 = int_to_ptr.vmem [resolvable:$true] %s115_s5  ;;  %s128_s30 = int_to_ptr.vmem [resolvable:$true] %s127_s30 }
  0x87   :  { %s1642_s3 = scalar_lea.hbm %s2202_s13, 16 }
  0x88   :  { %p1643_p6 = scmp.ne.s32.totalorder %s2202_s13, %s1642_s3  ;;  %p1646_p7 = scmp.lt.u32.totalorder %s1642_s3, %s2202_s13 }
  0x8a   :  { %p1648_p8 = pnand %p1646_p7, %p1643_p6 }
  0x8c   :  { %1651 = shalt.err (!%p1648_p8)
}
  0x8d   :  { %s1652_s10 = scalar_lea.vmem %s116_s5, 16  ;;  %s1656_s25 = scalar_lea.vmem %s116_s5, 32 }
  0x8e   :  { %p1653_p9 = scmp.ne.s32.totalorder %s116_s5, %s1652_s10  ;;  %p1657_p10 = scmp.lt.s32.totalorder %s116_s5, %s116_s5 }
  0x8f   :  { %p1658_p11 = scmp.lt.s32.totalorder %s1656_s25, %s1652_s10 }
  0x91   :  { %p1659_p12 = por %p1658_p11, %p1657_p10 }
  0x93   :  { %p1660_p13 = pnand %p1659_p12, %p1653_p9 }
  0x95   :  { %1663 = shalt.err (!%p1660_p13)
}
  0x96   :  { %118 = dma.hbm_to_vmem [thread:$0]  %s2202_s13, 16, %s116_s5, [#allocation14]  }
  0x97   :  { %s1664_s8 = scalar_lea.hbm %s2204_s15, 16 }
  0x98   :  { %p1665_p0 = scmp.ne.s32.totalorder %s2204_s15, %s1664_s8  ;;  %p1668_p1 = scmp.lt.u32.totalorder %s1664_s8, %s2204_s15 }
  0x9a   :  { %p1670_p2 = pnand %p1668_p1, %p1665_p0 }
  0x9c   :  { %1673 = shalt.err (!%p1670_p2)
}
  0x9d   :  { %s1674_s3 = scalar_lea.vmem %s128_s30, 16  ;;  %s1678_s28 = scalar_lea.vmem %s128_s30, 32 }
  0x9e   :  { %p1675_p3 = scmp.ne.s32.totalorder %s128_s30, %s1674_s3  ;;  %p1679_p4 = scmp.lt.s32.totalorder %s128_s30, %s128_s30 }
  0x9f   :  { %p1680_p5 = scmp.lt.s32.totalorder %s1678_s28, %s1674_s3 }
  0xa1   :  { %p1681_p6 = por %p1680_p5, %p1679_p4 }
  0xa3   :  { %p1682_p7 = pnand %p1681_p6, %p1675_p3 }
  0xa5   :  { %1685 = shalt.err (!%p1682_p7)
}
  0xa6   :  { %130 = dma.hbm_to_vmem [thread:$0]  %s2204_s15, 16, %s128_s30, [#allocation17]  }
  0xa7   :  { %1708 = dma.done.wait [#allocation5], 128  }
  0xa8   :  { %1709 = vsyncadd [#allocation5], 4294967168 }
  0xa9   :  { %1710 = dma.done.wait [#allocation8], 144  }
  0xaa   :  { %1711 = vsyncadd [#allocation8], 4294967152 }
  0xab   :  { %1712 = dma.done.wait [#allocation11], 32  }
  0xac   :  { %1713 = vsyncadd [#allocation11], 4294967264 }
  0xad   :  { %1714 = dma.done.wait [#allocation14], 32  }
  0xae   :  { %1715 = vsyncadd [#allocation14], 4294967264 }
  0xaf   :  { %1716 = dma.done.wait [#allocation17], 16  }
  0xb0   :  { %1717 = vsyncadd [#allocation17], 4294967280  ;;  %v190_v0 = vlaneseq  ;;  %vm178_vm0 = vcmask 7168   ;;  %v1728_v1 = vmov 0.0   ;;  %vm337_vm1 = vcmask 64512   ;;  %v188_v5 = vld [vmem:[#allocation4] sm:$0xff] }
  0xb1   :  { %179 = vst.msk [vmem:[#allocation3] sm:$0xff] %vm178_vm0, %v1728_v1  ;;  %1336 = vmatprep.subr.bf16.mxu0 %v1728_v1  ;;  %1344 = vmatprep.subr.bf16.mxu1 %v1728_v1  ;;  %v338_v6 = vsel %vm337_vm1, %v188_v5, 0.0  ;;  %v1729_v19 = vmov 0   ;;  %vm176_vm2 = vcmask 261120   ;;  %s2233_s26 = sld [smem:[#allocation25_spill]]  ;;  %s2234_s5 = sld [smem:[#allocation29_spill]] }
  0xb2   :  { %v191_v2 = vshrl.u32 %v190_v0, 7  ;;  %339 = vadd.xlane.f32.xlu0 %v338_v6  ;;  %1487 = vset.pattern.permute.xlu1 %v1729_v19  ;;  %177 = vst.msk [vmem:[#allocation2] sm:$0xff] %vm176_vm2, %v1728_v1  ;;  %vm1730_vm3 = vmmov 0   ;;  %vm319_vm4 = vcmask 1041409   ;;  %vm321_vm5 = vcmask 1042434   ;;  %s2235_s27 = sld [smem:[#allocation30_spill]] }
  0xb3   :  { %1486 = vset.pattern.permute.xlu0 %v1729_v19  ;;  %1340 = vmatprep.mubr.msk.bf16.mxu0 %vm1730_vm3, %v1728_v1  ;;  %vm323_vm6 = vcmask 1043459   ;;  %vm325_vm7 = vcmask 1044484   ;;  %vm327_vm8 = vcmask 1045509   ;;  %vm329_vm9 = vcmask 1046534   ;;  %s2236_s6 = sld [smem:[#allocation31_spill]]  ;;  %s2237_s3 = sld [smem:[#allocation28_spill]] }
  0xb4   :  { %v199_v3 = vsub.s32 1, %v191_v2  ;;  %v206_v4 = vsub.s32 2, %v191_v2  ;;  %v213_v9 = vsub.s32 3, %v191_v2  ;;  %v220_v11 = vsub.s32 4, %v191_v2  ;;  %1352 = vmatprep.mubr.msk.bf16.mxu1 %vm1730_vm3, %v1728_v1  ;;  %s1733_s13 = smov 16   ;;  %s1735_s8 = smov 38  }
  0xb5   :  { %v227_v13 = vsub.s32 5, %v191_v2  ;;  %v234_v15 = vsub.s32 6, %v191_v2  ;;  %v192_v16 = vsub.s32 0, %v191_v2  ;;  %v241_v18 = vsub.s32 7, %v191_v2  ;;  %s1737_s0 = smov [#allocation18]  }
  0xb6   :  { %v200_v7 = vrot.slane %v188_v5, %v199_v3  ;;  %v207_v8 = vrot.slane %v188_v5, %v206_v4  ;;  %v214_v10 = vrot.slane %v188_v5, %v213_v9  ;;  %v221_v12 = vrot.slane %v188_v5, %v220_v11 }
  0xb7   :  { %v228_v14 = vrot.slane %v188_v5, %v227_v13  ;;  %v235_v17 = vrot.slane %v188_v5, %v234_v15  ;;  %v193_v20 = vrot.slane %v188_v5, %v192_v16  ;;  %v242_v21 = vrot.slane %v188_v5, %v241_v18  ;;  %v181_v25 = vld [vmem:[%s2233_s26 + $0x8] sm:$0xff]  ;;  %v182_v27 = vld [vmem:[%s2233_s26 + $0x10] sm:$0xff]  ;;  %v183_v28 = vld [vmem:[%s2233_s26 + $0x18] sm:$0xff] }
  0xb8   :  { %202 = vbcast.lane.b32.xlu1 %v200_v7, 256  ;;  %v184_v30 = vld [vmem:[%s2233_s26 + $0x20] sm:$0xff]  ;;  %v185_v33 = vld [vmem:[%s2233_s26 + $0x28] sm:$0xff]  ;;  %v186_v36 = vld [vmem:[%s2233_s26 + $0x30] sm:$0xff]  ;;  %vm331_vm10 = vcmask 1047559   ;;  %vm424_vm11 = vcmask 523264  }
  0xb9   :  { %v187_v45 = vld [vmem:[%s2233_s26 + $0x38] sm:$0xff]  ;;  %v336_v48 = vld [vmem:[#allocation3] sm:$0xff]  ;;  %v180_v62 = vld [vmem:[%s2233_s26] sm:$0xff]  ;;  %vm658_vm13 = vcmask 130048  }
  0xbc   :  { %209 = vbcast.lane.b32.xlu1 %v207_v8, 256 }
  0xc0   :  { %216 = vbcast.lane.b32.xlu1 %v214_v10, 256 }
  0xc4   :  { %223 = vbcast.lane.b32.xlu1 %v221_v12, 256 }
  0xc8   :  { %230 = vbcast.lane.b32.xlu1 %v228_v14, 256  ;;  %195 = vbcast.lane.b32.xlu0 %v193_v20, 256 }
  0xcc   :  { %237 = vbcast.lane.b32.xlu1 %v235_v17, 256 }
  0xd0   :  { %244 = vbcast.lane.b32.xlu1 %v242_v21, 256 }
 0x12a   :  { %v203_v22 = vpop.permute.xlu1 %202 }
 0x12b   :  { %v247_v29 = vmul.f32 %v203_v22, %v181_v25 }
 0x12d   :  { %v262_v37 = vsel %vm176_vm2, %v247_v29, 0.0 }
 0x12e   :  { %v210_v23 = vpop.permute.xlu1 %209  ;;  %v263_v43 = vrot.slane %v262_v37, 4 }
 0x12f   :  { %v248_v31 = vmul.f32 %v210_v23, %v182_v27 }
 0x130   :  { %v264_v55 = vadd.f32 %v263_v43, %v262_v37 }
 0x131   :  { %v269_v39 = vsel %vm176_vm2, %v248_v31, 0.0 }
 0x132   :  { %v217_v24 = vpop.permute.xlu1 %216  ;;  %v270_v46 = vrot.slane %v269_v39, 4  ;;  %v265_v2 = vrot.slane %v264_v55, 2 }
 0x133   :  { %v249_v34 = vmul.f32 %v217_v24, %v183_v28  ;;  %v1488_v28 = vld [vmem:[%s2234_s5] sm:$0xff]  }
 0x134   :  { %v271_v58 = vadd.f32 %v270_v46, %v269_v39  ;;  %v266_v12 = vadd.f32 %v265_v2, %v264_v55  ;;  %1337 = vmatpush3.bf16.msra.mxu0 %v1488_v28  ;;  %v636_v28 = vld [vmem:[%s2237_s3] sm:$0xff] }
 0x135   :  { %v276_v41 = vsel %vm176_vm2, %v249_v34, 0.0  ;;  %1338 = vmatprep.subr.bf16.mxu0 %v1728_v1 }
 0x136   :  { %v224_v26 = vpop.permute.xlu1 %223  ;;  %v277_v49 = vrot.slane %v276_v41, 4  ;;  %v272_v5 = vrot.slane %v271_v58, 2  ;;  %v267_v23 = vrot.slane %v266_v12, 1 }
 0x137   :  { %v250_v35 = vmul.f32 %v224_v26, %v184_v30 }
 0x138   :  { %v278_v61 = vadd.f32 %v277_v49, %v276_v41  ;;  %v273_v15 = vadd.f32 %v272_v5, %v271_v58  ;;  %v268_v34 = vadd.f32 %v267_v23, %v266_v12  ;;  %v1493_v12 = vld [vmem:[%s2236_s6 + $0x18] sm:$0xff]  }
 0x139   :  { %v283_v44 = vsel %vm176_vm2, %v250_v35, 0.0 }
 0x13a   :  { %v231_v32 = vpop.permute.xlu1 %230  ;;  %v284_v52 = vrot.slane %v283_v44, 4  ;;  %v279_v8 = vrot.slane %v278_v61, 2  ;;  %v274_v26 = vrot.slane %v273_v15, 1 }
 0x13b   :  { %v251_v38 = vmul.f32 %v231_v32, %v185_v33  ;;  %v1489_v33 = vld [vmem:[%s2234_s5 + $0x8] sm:$0xff]   ;;  %s2238_s5 = sld [smem:[#allocation33_spill]] }
 0x13c   :  { %v285_v0 = vadd.f32 %v284_v52, %v283_v44  ;;  %v280_v18 = vadd.f32 %v279_v8, %v278_v61  ;;  %v275_v37 = vadd.f32 %v274_v26, %v273_v15  ;;  %1339 = vmatpush3.bf16.msra.mxu0 %v1489_v33 }
 0x13d   :  { %v290_v47 = vsel %vm176_vm2, %v251_v38, 0.0 }
 0x13e   :  { %v238_v40 = vpop.permute.xlu1 %237  ;;  %v291_v56 = vrot.slane %v290_v47, 4  ;;  %v286_v10 = vrot.slane %v285_v0, 2  ;;  %v281_v29 = vrot.slane %v280_v18, 1 }
 0x13f   :  { %v252_v42 = vmul.f32 %v238_v40, %v186_v36  ;;  %v340_v54 = vpop.xlane.xlu0 %339 }
 0x140   :  { %v341_v57 = vadd.f32 %v340_v54, %v336_v48  ;;  %v292_v3 = vadd.f32 %v291_v56, %v290_v47  ;;  %v287_v22 = vadd.f32 %v286_v10, %v285_v0  ;;  %v282_v39 = vadd.f32 %v281_v29, %v280_v18  ;;  %v1491_v10 = vld [vmem:[%s2236_s6 + $0x8] sm:$0xff]  }
 0x141   :  { %v297_v50 = vsel %vm176_vm2, %v252_v42, 0.0 }
 0x142   :  { %v245_v51 = vpop.permute.xlu1 %244  ;;  %v298_v59 = vrot.slane %v297_v50, 4  ;;  %343 = vst.msk [vmem:[#allocation3] sm:$0xff] %vm178_vm0, %v341_v57  ;;  %v293_v13 = vrot.slane %v292_v3, 2  ;;  %v288_v32 = vrot.slane %v287_v22, 1 }
 0x143   :  { %v253_v53 = vmul.f32 %v245_v51, %v187_v45  ;;  %v196_v4 = vpop.permute.xlu0 %195  ;;  %v189_v51 = vld [vmem:[#allocation2] sm:$0xff] }
 0x144   :  { %v246_v6 = vmul.f32 %v196_v4, %v180_v62  ;;  %v299_v7 = vadd.f32 %v298_v59, %v297_v50  ;;  %v294_v24 = vadd.f32 %v293_v13, %v292_v3  ;;  %v289_v42 = vadd.f32 %v288_v32, %v287_v22 }
 0x145   :  { %v304_v60 = vsel %vm176_vm2, %v253_v53, 0.0 }
 0x146   :  { %v305_v63 = vrot.slane %v304_v60, 4  ;;  %v255_v11 = vsel %vm176_vm2, %v246_v6, 0.0  ;;  %v300_v16 = vrot.slane %v299_v7, 2  ;;  %v295_v35 = vrot.slane %v294_v24, 1 }
 0x147   :  { %v256_v14 = vrot.slane %v255_v11, 4 }
 0x148   :  { %v306_v9 = vadd.f32 %v305_v63, %v304_v60  ;;  %v301_v27 = vadd.f32 %v300_v16, %v299_v7  ;;  %v296_v43 = vadd.f32 %v295_v35, %v294_v24  ;;  %v1269_v60 = vld [vmem:[%s2235_s27] ss:$0 sm:$0xff] }
 0x149   :  { %v348_v17 = vld [vmem:[#allocation3] sm:$0xff]  ;;  %v257_v19 = vadd.f32 %v256_v14, %v255_v11  ;;  %v1492_v11 = vld [vmem:[%s2236_s6 + $0x10] sm:$0xff]  }
 0x14a   :  { %v307_v20 = vrot.slane %v306_v9, 2  ;;  %v349_v21 = vadd.f32 1e-08, %v348_v17  ;;  %v302_v38 = vrot.slane %v301_v27, 1 }
 0x14b   :  { %v258_v25 = vrot.slane %v257_v19, 2 }
 0x14c   :  { %352 = vperm.xlu0 %1486, %v349_v21   ;;  %v308_v31 = vadd.f32 %v307_v20, %v306_v9  ;;  %v303_v46 = vadd.f32 %v302_v38, %v301_v27  ;;  %v1490_v9 = vld [vmem:[%s2236_s6] sm:$0xff]   ;;  %s1734_s6 = smov 32  }
 0x14d   :  { %v259_v30 = vadd.f32 %v258_v25, %v257_v19  ;;  %1345 = vmatpush3.bf16.msra.mxu1 %v1490_v9  ;;  %v1273_v21 = vld [vmem:[#allocation9] ss:$0 sm:$0xff]  ;;  %v1279_v9 = vld [vmem:[#allocation10] ss:$0 sm:$0xff] }
 0x14e   :  { %v309_v41 = vrot.slane %v308_v31, 1  ;;  %1346 = vmatprep.subr.bf16.mxu1 %v1728_v1 }
 0x14f   :  { %v260_v36 = vrot.slane %v259_v30, 1 }
 0x150   :  { %v310_v48 = vadd.f32 %v309_v41, %v308_v31  ;;  %v1281_v31 = vld [vmem:[#allocation12] ss:$0 sm:$0xff] }
 0x151   :  { %v261_v40 = vadd.f32 %v260_v36, %v259_v30  ;;  %1347 = vmatpush3.bf16.msra.mxu1 %v1491_v10  ;;  %v542_v41 = vld [vmem:[%s2238_s5] sm:$0xff] }
 0x152   :  { %1348 = vmatprep.subr.bf16.mxu1 %v1728_v1 }
 0x153   :  { %v320_v44 = vsel %vm319_vm4, %v268_v34, %v261_v40  ;;  %v1282_v34 = vld [vmem:[#allocation13] ss:$0 sm:$0xff]  ;;  %v1731_v40 = vmov 0.0|0.0  }
 0x154   :  { %v322_v45 = vsel %vm321_vm5, %v275_v37, %v320_v44  ;;  %1429 = vmatprep.subr.bf16.mxu0 %v1731_v40  ;;  %v544_v44 = vld [vmem:[%s2238_s5 + $0x10] sm:$0xff]  ;;  %vm1245_vm5 = vcmask 572416  }
 0x155   :  { %v324_v47 = vsel %vm323_vm6, %v282_v39, %v322_v45  ;;  %1349 = vmatpush3.bf16.msra.mxu1 %v1492_v11  ;;  %v545_v45 = vld [vmem:[%s2238_s5 + $0x18] sm:$0xff] }
 0x156   :  { %v326_v49 = vsel %vm325_vm7, %v289_v42, %v324_v47  ;;  %1350 = vmatprep.subr.bf16.mxu1 %v1728_v1  ;;  %v543_v42 = vld [vmem:[%s2238_s5 + $0x8] sm:$0xff] }
 0x157   :  { %v328_v50 = vsel %vm327_vm8, %v296_v43, %v326_v49  ;;  %v1430_v43 = vpack.c.bf16 %v543_v42, %v542_v41 }
 0x158   :  { %v330_v52 = vsel %vm329_vm9, %v303_v46, %v328_v50  ;;  %v1433_v46 = vpack.c.bf16 %v545_v45, %v544_v44 }
 0x159   :  { %v332_v53 = vsel %vm331_vm10, %v310_v48, %v330_v52  ;;  %1351 = vmatpush3.bf16.msra.mxu1 %v1493_v12 }
 0x15a   :  { %v334_v54 = vadd.f32 %v332_v53, %v189_v51  ;;  %1441 = vmatprep.subr.bf16.mxu1 %v1731_v40 }
 0x15c   :  { %335 = vst.msk [vmem:[#allocation2] sm:$0xff] %vm176_vm2, %v334_v54 }
 0x163   :  { %v347_v57 = vld [vmem:[#allocation2] sm:$0xff] }
 0x1cb   :  { %v353_v55 = vpop.permute.xlu0 %352 }
 0x1cc   :  { %1494 = vrcp.f32 %v353_v55 }
 0x1d6   :  { %v1495_v56 = vpop.eup %1494 }
 0x1d7   :  { %v356_v58 = vmul.f32 %v1495_v56, %v347_v57 }
 0x1d9   :  { %v357_v59 = vpack.c.bf16 %v356_v58, %v356_v58 }
 0x1db   :  { %1341 = vmatmul.mubr.msk.bf16.vlgmr.msra.gmra.mrb[0].mxu0 %vm176_vm2, %v357_v59  ;;  %v676_v59 = vld [vmem:[%s2201_s12] sm:$0xff] }
 0x1dc   :  { %1364 = vmatprep.mubr.msk.f32.mxu0 %vm1730_vm3, %v1728_v1  ;;  %1431 = vmatpush3.bf16.msra.mxu0 %v1430_v43 }
 0x1dd   :  { %1432 = vmatprep.subr.bf16.mxu0 %v1731_v40 }
 0x1e0   :  { %1434 = vmatpush3.bf16.msra.mxu0 %v1433_v46 }
 0x1e1   :  { %1435 = vmatprep.subr.bf16.mxu0 %v1731_v40 }
 0x2ae   :  { %v418_v61 = vpop.f32.mrb[0].mxu0 }
 0x2af   :  { %v419_v62 = vadd.f32 %v1269_v60, %v418_v61  ;;  %v1342_v63 = vpop.f32.mrb[1].mxu0  ;;  %v677_v60 = vld [vmem:[%s2201_s12 + $0x8] sm:$0xff] }
 0x2b0   :  { %v421_v0 = vpop.f32.mrb[2].mxu0  ;;  %v1436_v61 = vpack.c.bf16 %v677_v60, %v676_v59 }
 0x2b1   :  { %v1343_v2 = vpop.f32.mrb[3].mxu0  ;;  %v425_v3 = vsel %vm424_vm11, %v419_v62, 0.0 }
 0x2b2   :  { %426 = vadd.xlane.f32.xlu1 %v425_v3  ;;  %v774_v3 = vld [vmem:[%s2203_s14] sm:$0xff] }
 0x33f   :  { %v427_v4 = vpop.xlane.xlu1 %426 }
 0x340   :  { %v429_v5 = vmul.f32 0.015625, %v427_v4  ;;  %v775_v4 = vld [vmem:[%s2203_s14 + $0x8] sm:$0xff] }
 0x342   :  { %v430_v6 = vsub.f32 %v419_v62, %v429_v5 }
 0x344   :  { %v431_v7 = vmul.f32 %v430_v6, %v430_v6 }
 0x346   :  { %v432_v8 = vsel %vm424_vm11, %v431_v7, 0.0  ;;  %v1439_v7 = vpack.c.bf16 %v775_v4, %v774_v3 }
 0x347   :  { %433 = vadd.xlane.f32.xlu0 %v432_v8 }
 0x3d4   :  { %v434_v13 = vpop.xlane.xlu0 %433 }
 0x3d5   :  { %v435_v14 = vmul.f32 0.015625, %v434_v13 }
 0x3d7   :  { %v436_v15 = vadd.f32 1e-05, %v435_v14 }
 0x3d9   :  { %1496 = vrsqrt.f32 %v436_v15  ;;  %v1285_v15 = vld [vmem:[#allocation16] ss:$0 sm:$0xff] }
 0x3e3   :  { %v1497_v16 = vpop.eup %1496 }
 0x3e4   :  { %v438_v17 = vmul.f32 %v1497_v16, %v430_v6 }
 0x3e6   :  { %vm439_vm12 = vcmp.gt.f32.partialorder %v438_v17, 0.0  ;;  %v440_v18 = vmul.f32 0.01, %v438_v17 }
 0x3e8   :  { %v441_v19 = vsel %vm439_vm12, %v438_v17, %v440_v18 }
 0x3e9   :  { %v442_v20 = vpack.c.bf16 %v441_v19, %v441_v19 }
 0x3eb   :  { %1353 = vmatmul.mubr.msk.bf16.vlgmr.msra.gmra.mrb[0].mxu1 %vm424_vm11, %v442_v20 }
 0x3ec   :  { %1397 = vmatprep.mubr.msk.f32.mxu1 %vm1730_vm3, %v1728_v1 }
 0x4be   :  { %v519_v22 = vpop.f32.mrb[0].mxu1 }
 0x4bf   :  { %v520_v23 = vadd.f32 %v1273_v21, %v519_v22  ;;  %v1354_v24 = vpop.f32.mrb[1].mxu1 }
 0x4c0   :  { %v522_v25 = vpop.f32.mrb[2].mxu1 }
 0x4c1   :  { %v1355_v26 = vpop.f32.mrb[3].mxu1  ;;  %v525_v27 = vsel %vm176_vm2, %v520_v23, 0.0 }
 0x4c2   :  { %526 = vadd.xlane.f32.xlu1 %v525_v27 }
 0x4d3   :  { %640 = vperm.xlu1 %1487, %v636_v28   ;;  %v872_v28 = vld [vmem:[%s2205_s16] sm:$0xff] }
 0x54f   :  { %v527_v29 = vpop.xlane.xlu1 %526 }
 0x550   :  { %v529_v30 = vmul.f32 0.03125, %v527_v29  ;;  %v873_v29 = vld [vmem:[%s2205_s16 + $0x8] sm:$0xff] }
 0x552   :  { %v530_v32 = vsub.f32 %v520_v23, %v529_v30  ;;  %v1283_v23 = vld [vmem:[#allocation15] ss:$0 sm:$0xff]  ;;  %v1442_v30 = vpack.c.bf16 %v873_v29, %v872_v28  ;;  %v626_v29 = vld [vmem:[#allocation7] sm:$0xff] }
 0x553   :  { %v641_v33 = vpop.permute.xlu1 %640 }
 0x554   :  { %v649_v35 = vmul.f32 %v1281_v31, %v641_v33  ;;  %v531_v36 = vmul.f32 %v530_v32, %v530_v32  ;;  %1443 = vmatpush3.bf16.msra.mxu1 %v1442_v30  ;;  %v874_v31 = vld [vmem:[%s2205_s16 + $0x10] sm:$0xff] }
 0x555   :  { %1444 = vmatprep.subr.bf16.mxu1 %v1731_v40 }
 0x556   :  { %v532_v37 = vsel %vm176_vm2, %v531_v36, 0.0  ;;  %v657_v38 = vadd.f32 %v1282_v34, %v649_v35  ;;  %v876_v34 = vld [vmem:[%s2205_s16 + $0x20] sm:$0xff]  ;;  %v877_v35 = vld [vmem:[%s2205_s16 + $0x28] sm:$0xff] }
 0x557   :  { %533 = vadd.xlane.f32.xlu0 %v532_v37  ;;  %v1448_v36 = vpack.c.bf16 %v877_v35, %v876_v34  ;;  %v878_v37 = vld [vmem:[%s2205_s16 + $0x30] sm:$0xff]  ;;  %v1068_v34 = vld [vmem:[%s2209_s20 + $0x18] sm:$0xff] }
 0x558   :  { %v659_v39 = vsel %vm658_vm13, %v657_v38, 0.0 }
 0x55b   :  { %660 = vadd.xlane.f32.xlu0 %v659_v39 }
 0x5e4   :  { %v534_v47 = vpop.xlane.xlu0 %533 }
 0x5e5   :  { %v535_v48 = vmul.f32 0.03125, %v534_v47 }
 0x5e7   :  { %v536_v49 = vadd.f32 1e-05, %v535_v48 }
 0x5e8   :  { %v661_v50 = vpop.xlane.xlu0 %660 }
 0x5e9   :  { %1498 = vrsqrt.f32 %v536_v49  ;;  %v663_v51 = vmul.f32 0.0625, %v661_v50 }
 0x5eb   :  { %v664_v52 = vsub.f32 %v657_v38, %v663_v51  ;;  %v879_v38 = vld [vmem:[%s2205_s16 + $0x38] sm:$0xff] }
 0x5ec   :  { %v1451_v39 = vpack.c.bf16 %v879_v38, %v878_v37 }
 0x5ed   :  { %v665_v53 = vmul.f32 %v664_v52, %v664_v52 }
 0x5ef   :  { %v666_v54 = vsel %vm658_vm13, %v665_v53, 0.0  ;;  %v1149_v53 = vld [vmem:[%s2211_s22] sm:$0xff] }
 0x5f0   :  { %667 = vadd.xlane.f32.xlu0 %v666_v54  ;;  %v1150_v54 = vld [vmem:[%s2211_s22 + $0x8] sm:$0xff] }
 0x5f3   :  { %v1499_v55 = vpop.eup %1498 }
 0x5f4   :  { %v538_v56 = vmul.f32 %v1499_v55, %v530_v32  ;;  %v875_v32 = vld [vmem:[%s2205_s16 + $0x18] sm:$0xff]  ;;  %v1466_v55 = vpack.c.bf16 %v1150_v54, %v1149_v53 }
 0x5f5   :  { %v1445_v33 = vpack.c.bf16 %v875_v32, %v874_v31 }
 0x5f6   :  { %vm539_vm14 = vcmp.gt.f32.partialorder %v538_v56, 0.0  ;;  %v540_v57 = vmul.f32 0.01, %v538_v56 }
 0x5f7   :  { %1446 = vmatpush3.bf16.msra.mxu1 %v1445_v33  ;;  %v1067_v33 = vld [vmem:[%s2209_s20 + $0x10] sm:$0xff] }
 0x5f8   :  { %v541_v58 = vsel %vm539_vm14, %v538_v56, %v540_v57  ;;  %1447 = vmatprep.subr.bf16.mxu1 %v1731_v40  ;;  %v1463_v37 = vpack.c.bf16 %v1068_v34, %v1067_v33 }
 0x5f9   :  { %1365 = vmatmul.mubr.msk.f32.vlgmr.msra.gmra.mrb[4].mxu0 %vm176_vm2, %v541_v58 }
 0x5fa   :  { %1371 = vmatprep.mubr.msk.f32.mxu0 %vm1730_vm3, %v1728_v1  ;;  %1437 = vmatpush3.bf16.msra.mxu0 %v1436_v61 }
 0x5fb   :  { %1438 = vmatprep.subr.bf16.mxu0 %v1731_v40  ;;  %1449 = vmatpush3.bf16.msra.mxu1 %v1448_v36 }
 0x5fc   :  { %1450 = vmatprep.subr.bf16.mxu1 %v1731_v40 }
 0x5ff   :  { %1452 = vmatpush3.bf16.msra.mxu1 %v1451_v39 }
 0x600   :  { %1465 = vmatprep.subr.bf16.mxu1 %v1731_v40 }
 0x67d   :  { %v668_v62 = vpop.xlane.xlu0 %667 }
 0x67e   :  { %v669_v63 = vmul.f32 0.0625, %v668_v62 }
 0x680   :  { %v670_v0 = vadd.f32 1e-05, %v669_v63  ;;  %v1287_v63 = vld [vmem:[%s2206_s17] ss:$0 sm:$0xff]  ;;  %s1732_s17 = smov 112  }
 0x682   :  { %1500 = vrsqrt.f32 %v670_v0 }
 0x68c   :  { %v1501_v2 = vpop.eup %1500 }
 0x68d   :  { %v672_v5 = vmul.f32 %v1501_v2, %v664_v52 }
 0x68f   :  { %vm673_vm15 = vcmp.gt.f32.partialorder %v672_v5, 0.0  ;;  %v674_v6 = vmul.f32 0.01, %v672_v5 }
 0x691   :  { %v675_v8 = vsel %vm673_vm15, %v672_v5, %v674_v6 }
 0x692   :  { %1372 = vmatmul.mubr.msk.f32.vlgmr.msra.gmra.mrb[6].mxu0 %vm658_vm13, %v675_v8 }
 0x693   :  { %1440 = vmatpush3.bf16.msra.mxu0 %v1439_v7  ;;  %1378 = vmatprep.mubr.msk.f32.mxu0 %vm1730_vm3, %v1728_v1 }
 0x694   :  { %1453 = vmatprep.subr.bf16.mxu0 %v1731_v40 }
 0x6cc   :  { %v622_v10 = vpop.f32.mrb[4].mxu0 }
 0x6cd   :  { %v2079_v11 = vadd.f32 %v1279_v9, %v622_v10  ;;  %v1366_v12 = vpop.f32.mrb[5].mxu0 }
 0x6cf   :  { %1379 = vmatmul.mubr.msk.f32.vlgmr.msra.gmra.mrb[8].mxu0 %vm658_vm13, %v2079_v11 }
 0x6d0   :  { %1408 = vmatprep.mubr.msk.f32.mxu0 %vm1730_vm3, %v1728_v1 }
 0x765   :  { %v754_v13 = vpop.f32.mrb[6].mxu0 }
 0x766   :  { %v1373_v14 = vpop.f32.mrb[7].mxu0  ;;  %v755_v25 = vadd.f32 %v1283_v23, %v754_v13  ;;  %v627_v13 = vmul.f32 0.5, %v2079_v11 }
 0x768   :  { %v758_v27 = vsel %vm658_vm13, %v755_v25, 0.0  ;;  %v628_v14 = vmul.f32 1.442695, %v627_v13 }
 0x7a2   :  { %v852_v16 = vpop.f32.mrb[8].mxu0 }
 0x7a3   :  { %v853_v17 = vadd.f32 %v1285_v15, %v852_v16  ;;  %v1380_v18 = vpop.f32.mrb[9].mxu0  ;;  %v976_v16 = vld [vmem:[%s2207_s18] sm:$0xff] }
 0x7a4   :  { %v978_v18 = vld [vmem:[%s2207_s18 + $0x10] sm:$0xff] }
 0x7a5   :  { %v856_v19 = vsel %vm424_vm11, %v853_v17, 0.0 }
 0x7a6   :  { %857 = vadd.xlane.f32.xlu0 %v856_v19 }
 0x833   :  { %v858_v20 = vpop.xlane.xlu0 %857 }
 0x834   :  { %v859_v21 = vmul.f32 0.015625, %v858_v20  ;;  %v979_v20 = vld [vmem:[%s2207_s18 + $0x18] sm:$0xff] }
 0x836   :  { %v860_v22 = vsub.f32 %v853_v17, %v859_v21  ;;  %v977_v17 = vld [vmem:[%s2207_s18 + $0x8] sm:$0xff]  ;;  %v1457_v21 = vpack.c.bf16 %v979_v20, %v978_v18 }
 0x837   :  { %v1454_v19 = vpack.c.bf16 %v977_v17, %v976_v16 }
 0x838   :  { %v861_v24 = vmul.f32 %v860_v22, %v860_v22 }
 0x839   :  { %1455 = vmatpush3.bf16.msra.mxu0 %v1454_v19 }
 0x83a   :  { %v862_v26 = vsel %vm424_vm11, %v861_v24, 0.0  ;;  %1456 = vmatprep.subr.bf16.mxu0 %v1731_v40 }
 0x83b   :  { %863 = vadd.xlane.f32.xlu0 %v862_v26  ;;  %v1065_v26 = vld [vmem:[%s2209_s20] sm:$0xff] }
 0x83d   :  { %1458 = vmatpush3.bf16.msra.mxu0 %v1457_v21 }
 0x83e   :  { %1459 = vmatprep.subr.bf16.mxu0 %v1731_v40 }
 0x83f   :  { %759 = vadd.xlane.f32.xlu0 %v758_v27  ;;  %v1066_v27 = vld [vmem:[%s2209_s20 + $0x8] sm:$0xff] }
 0x840   :  { %v1460_v32 = vpack.c.bf16 %v1066_v27, %v1065_v26 }
 0x8c8   :  { %v864_v41 = vpop.xlane.xlu0 %863 }
 0x8c9   :  { %v865_v42 = vmul.f32 0.015625, %v864_v41 }
 0x8cb   :  { %v866_v43 = vadd.f32 1e-05, %v865_v42  ;;  %v1289_v42 = vld [vmem:[%s2208_s19] ss:$0 sm:$0xff]  ;;  %s1736_s19 = smov 70  }
 0x8cc   :  { %v760_v44 = vpop.xlane.xlu0 %759 }
 0x8cd   :  { %1502 = vrsqrt.f32 %v866_v43  ;;  %v761_v45 = vmul.f32 0.0625, %v760_v44 }
 0x8cf   :  { %v762_v46 = vsub.f32 %v755_v25, %v761_v45 }
 0x8d1   :  { %v763_v47 = vmul.f32 %v762_v46, %v762_v46 }
 0x8d3   :  { %v764_v48 = vsel %vm658_vm13, %v763_v47, 0.0 }
 0x8d4   :  { %765 = vadd.xlane.f32.xlu0 %v764_v48  ;;  %v1293_v48 = vld [vmem:[%s2212_s23] ss:$0 sm:$0xff] }
 0x8d7   :  { %v1503_v49 = vpop.eup %1502 }
 0x8d8   :  { %v868_v50 = vmul.f32 %v1503_v49, %v860_v22 }
 0x8da   :  { %vm869_vm0 = vcmp.gt.f32.partialorder %v868_v50, 0.0  ;;  %v870_v51 = vmul.f32 0.01, %v868_v50 }
 0x8dc   :  { %v871_v52 = vsel %vm869_vm0, %v868_v50, %v870_v51 }
 0x8dd   :  { %1398 = vmatmul.mubr.msk.f32.vlgmr.msra.gmra.mrb[4].mxu1 %vm424_vm11, %v871_v52 }
 0x8de   :  { %1426 = vmatprep.mubr.msk.f32.mxu1 %vm1730_vm3, %v1728_v1  ;;  %1467 = vmatpush3.bf16.msra.mxu1 %v1466_v55 }
 0x961   :  { %v766_v56 = vpop.xlane.xlu0 %765 }
 0x962   :  { %v767_v57 = vmul.f32 0.0625, %v766_v56 }
 0x964   :  { %v768_v58 = vadd.f32 1e-05, %v767_v57 }
 0x966   :  { %1504 = vrsqrt.f32 %v768_v58 }
 0x967   :  { %1506 = vpow2.f32 %v628_v14 }
 0x970   :  { %v1505_v59 = vpop.eup %1504 }
 0x971   :  { %v770_v60 = vmul.f32 %v1505_v59, %v762_v46  ;;  %v1507_v15 = vpop.eup %1506 }
 0x973   :  { %vm771_vm1 = vcmp.gt.f32.partialorder %v770_v60, 0.0  ;;  %v772_v61 = vmul.f32 0.01, %v770_v60 }
 0x975   :  { %v773_v62 = vsel %vm771_vm1, %v770_v60, %v772_v61 }
 0x976   :  { %1427 = vmatmul.mubr.msk.f32.vlgmr.msra.gmra.mrb[6].mxu1 %vm658_vm13, %v773_v62 }
 0x9b0   :  { %v956_v0 = vpop.f32.mrb[4].mxu1 }
 0x9b1   :  { %v957_v2 = vadd.f32 %v1287_v63, %v956_v0  ;;  %v1399_v3 = vpop.f32.mrb[5].mxu1 }
 0x9b3   :  { %v960_v4 = vsel %vm176_vm2, %v957_v2, 0.0 }
 0x9b4   :  { %961 = vadd.xlane.f32.xlu1 %v960_v4 }
 0xa41   :  { %v962_v5 = vpop.xlane.xlu1 %961 }
 0xa42   :  { %v963_v6 = vmul.f32 0.03125, %v962_v5 }
 0xa44   :  { %v964_v7 = vsub.f32 %v957_v2, %v963_v6 }
 0xa46   :  { %v965_v8 = vmul.f32 %v964_v7, %v964_v7 }
 0xa48   :  { %v966_v9 = vsel %vm176_vm2, %v965_v8, 0.0 }
 0xa49   :  { %967 = vadd.xlane.f32.xlu0 %v966_v9  ;;  %v1226_v10 = vpop.f32.mrb[6].mxu1 }
 0xa4a   :  { %v1428_v12 = vpop.f32.mrb[7].mxu1  ;;  %v1227_v49 = vadd.f32 %v1293_v48, %v1226_v10 }
 0xa5f   :  { %631 = vrot.lane.b32.xlu0 %v1507_v15, %s1732_s17  ;;  %s1256_s17 = sshll.u32 %s1737_s0, 4  ;;  %s1257_s17 = int_to_ptr.vmem [resolvable:$true] %s1256_s17 }
 0xa60   :  { %p1691_p9 = scmp.lt.s32.totalorder %s1257_s17, %s1257_s17 }
 0xa63   :  { %1061 = vrot.lane.b32.xlu0 %v773_v62, %s1733_s13 }
 0xad6   :  { %v968_v22 = vpop.xlane.xlu0 %967 }
 0xad7   :  { %v969_v23 = vmul.f32 0.03125, %v968_v22 }
 0xad9   :  { %v970_v24 = vadd.f32 1e-05, %v969_v23 }
 0xada   :  { %v632_v30 = vpop.permute.xlu0 %631 }
 0xadb   :  { %1508 = vrsqrt.f32 %v970_v24  ;;  %v634_v35 = vmul.f32 %v632_v30, %v626_v29 }
 0xadd   :  { %v635_v38 = vadd.f32 %v634_v35, %v2079_v11 }
 0xade   :  { %v1062_v39 = vpop.permute.xlu0 %1061 }
 0xadf   :  { %v1064_v41 = vsel %vm658_vm13, %v635_v38, %v1062_v39 }
 0xae5   :  { %v1509_v25 = vpop.eup %1508 }
 0xae6   :  { %v972_v28 = vmul.f32 %v1509_v25, %v964_v7 }
 0xae8   :  { %vm973_vm4 = vcmp.gt.f32.partialorder %v972_v28, 0.0  ;;  %v974_v31 = vmul.f32 0.01, %v972_v28 }
 0xaea   :  { %v975_v36 = vsel %vm973_vm4, %v972_v28, %v974_v31 }
 0xaeb   :  { %1409 = vmatmul.mubr.msk.f32.vlgmr.msra.gmra.mrb[10].mxu0 %vm176_vm2, %v975_v36 }
 0xaec   :  { %1461 = vmatpush3.bf16.msra.mxu0 %v1460_v32  ;;  %1419 = vmatprep.mubr.msk.f32.mxu0 %vm1730_vm3, %v1728_v1  ;;  %v1291_v1 = vld [vmem:[%s2210_s21] ss:$0 sm:$0xff]  ;;  %vm1243_vm3 = vcmask 310272   ;;  %s1686_s21 = scalar_lea.vmem %s1257_s17, 256 }
 0xaed   :  { %1462 = vmatprep.subr.bf16.mxu0 %v1731_v40  ;;  %p1687_p8 = scmp.ne.s32.totalorder %s1257_s17, %s1686_s21  ;;  %p1692_p10 = scmp.lt.s32.totalorder %s1686_s21, %s1686_s21 }
 0xaef   :  { %p1693_p11 = por %p1692_p10, %p1691_p9 }
 0xaf0   :  { %1464 = vmatpush3.bf16.msra.mxu0 %v1463_v37 }
 0xaf1   :  { %p1694_p12 = pnand %p1693_p11, %p1687_p8 }
 0xaf3   :  { %1420 = vmatmul.mubr.msk.f32.vlgmr.msra.gmra.mrb[12].mxu0 %vm176_vm2, %v1064_v41 }
 0xbbe   :  { %v1056_v43 = vpop.f32.mrb[10].mxu0 }
 0xbbf   :  { %v1057_v44 = vadd.f32 %v1289_v42, %v1056_v43  ;;  %v1410_v45 = vpop.f32.mrb[11].mxu0 }
 0xbc1   :  { %1231 = vrot.lane.b32.xlu1 %v1057_v44, %s1734_s6 }
 0xbc6   :  { %v1145_v40 = vpop.f32.mrb[12].mxu0 }
 0xbc7   :  { %v1146_v46 = vadd.f32 %v1291_v1, %v1145_v40  ;;  %v1421_v47 = vpop.f32.mrb[13].mxu0 }
 0xbc9   :  { %1235 = vrot.lane.b32.xlu0 %v1146_v46, %s1735_s8 }
 0xbcd   :  { %1239 = vrot.lane.b32.xlu0 %v1227_v49, %s1736_s19 }
 0xc33   :  { %v1232_v50 = vpop.permute.xlu1 %1231 }
 0xc34   :  { %v1242_v52 = vsel %vm176_vm2, %v2079_v11, %v1232_v50 }
 0xc3b   :  { %v1236_v51 = vpop.permute.xlu0 %1235 }
 0xc3c   :  { %v1244_v53 = vsel %vm1243_vm3, %v1242_v52, %v1236_v51 }
 0xc3f   :  { %v1240_v54 = vpop.permute.xlu0 %1239 }
 0xc40   :  { %v1246_v55 = vsel %vm1245_vm5, %v1244_v53, %v1240_v54  ;;  %v1247_v56 = vsel %vm1243_vm3, %v1240_v54, 0.0 }
 0xc41   :  { %1248 = vst [vmem:[#allocation18] sm:$0xff] %v1246_v55  ;;  %1249 = vst [vmem:[#allocation18 + $0x8] sm:$0xff] %v1247_v56 }
 0xc42   :  { %1697 = shalt.err (!%p1694_p12)
}
 0xc43   :  { %s1698_s1 = scalar_lea.hbm %s2213_s24, 256 }
 0xc44   :  { %p1699_p13 = scmp.ne.s32.totalorder %s2213_s24, %s1698_s1  ;;  %p1702_p0 = scmp.lt.u32.totalorder %s1698_s1, %s2213_s24 }
 0xc46   :  { %p1704_p1 = pnand %p1702_p0, %p1699_p13 }
 0xc48   :  { %1707 = shalt.err (!%p1704_p1)
}
 0xc49   :  { %1259 = dma.vmem_to_hbm [thread:$0]  %s1257_s17, 256, %s2213_s24, [#allocation6]  }
 0xc4a   :  { %1718 = dma.done.wait [#allocation6], 256  }
 0xc4b   :  { %1719 = vsyncadd [#allocation6], 4294967040 }
 0xc4c   :  { %1263 = vsyncpa [#allocation5], 1 }
 0xc4d   :  { %1264 = vsyncpa [#allocation8], 1 }
 0xc4e   :  { %1265 = vsyncpa [#allocation11], 1 }
 0xc4f   :  { %1266 = vsyncpa [#allocation14], 1 }
 0xc50   :  { %1267 = vsyncpa [#allocation17], 1 }
 0xc51   :  { %1268 = vsyncpa [#allocation6], 1 }

</bundles_post_ra>
